<compile_context>
chip_gen: v6e
topology: v6e:2x2x1
jax: 0.10.0
libtpu: 0.0.40
codegen_flags: <defaults>
</compile_context>

<pallas_src>
import functools

import numpy as np
import jax
import jax.numpy as jnp
from jax.experimental import pallas as pl
from jax.experimental.pallas import tpu as pltpu

# ----------------------------- constants (module-level, like the torch file) --
CLASS_NUM = 4
PER_ANCHOR = 5 + CLASS_NUM               # conf, tx, ty, tw, th, cls0..cls3  (9)
NUM_ANCHORS = 3
HEAD_CHANNELS = NUM_ANCHORS * PER_ANCHOR  # 27
OUT_FIELDS = 7                            # conf, ox, oy, w, h, cls, n (field-major, x3 anchors)
META_ROWS = 11                            # stride, w_idx, h_idx, n_idx, valid, aw0..2, ah0..2

ANCHORS_GROUP = {
    13: [[116.0, 90.0], [156.0, 198.0], [373.0, 326.0]],
    26: [[30.0, 61.0], [62.0, 45.0], [59.0, 119.0]],
    52: [[10.0, 13.0], [16.0, 30.0], [33.0, 23.0]],
}
SCALES = ((13, 32), (26, 16), (52, 8))

# permutation: anchor-major checkpoint layout (row = a*9+f) -> field-major (row = f*3+a)
FIELD_MAJOR_PERM = np.array(
    [a * PER_ANCHOR + f for f in range(PER_ANCHOR) for a in range(NUM_ANCHORS)],
    dtype=np.int32)


# ----------------------------- fused Pallas kernel: 1x1-conv head + decode ----
def _fused_head_decode_kernel(x_ref, w_ref, b_ref, meta_ref, out_ref):
    # x_ref   : (cin, tm)              pooled features, lane-dense (all scales concatenated)
    # w_ref   : (cin, 27, tm)          per-lane, field-major 1x1-conv weights
    # b_ref   : (27, tm)               per-lane, field-major bias
    # meta_ref: (11, tm)               per-lane decode metadata
    # out_ref : (21, tm)               field-major [conf|ox|oy|w|h|cls|n] x 3 anchors
    cin = x_ref.shape[0]
    x = x_ref[...]

    # 1x1-conv head as cin broadcast FMAs on the VPU (a 27x4 contraction would use <1% of the MXU).
    feat = b_ref[...]
    for ci in range(cin):
        feat = feat + w_ref[ci] * x[ci:ci + 1, :]

    stride = meta_ref[0:1, :]
    w_idx = meta_ref[1:2, :]
    h_idx = meta_ref[2:3, :]
    n_idx = meta_ref[3:4, :]
    valid = meta_ref[4:5, :]
    aw = meta_ref[5:8, :]          # (3, tm) anchor widths  (vary per anchor AND per scale)
    ah = meta_ref[8:11, :]         # (3, tm) anchor heights

    # padded lanes can never pass any threshold on the host
    conf = jnp.where(valid > 0.5, feat[0:3, :], -jnp.inf)
    tx = feat[3:6, :]
    ty = feat[6:9, :]
    tw = feat[9:12, :]
    th = feat[12:15, :]

    ox = (w_idx + tx) * stride
    oy = (h_idx + ty) * stride
    bw = jnp.exp(tw) * aw
    bh = jnp.exp(th) * ah

    # first-occurrence class argmax over CLASS_NUM (3, tm) blocks -- pure VPU, no XLU reduce
    best = feat[15:18, :]
    cls = jnp.zeros_like(best)
    for ci in range(1, CLASS_NUM):
        v = feat[15 + 3 * ci:18 + 3 * ci, :]
        better = v > best                      # strict > keeps the first index on ties
        cls = jnp.where(better, float(ci), cls)
        best = jnp.maximum(best, v)

    # 7 field-major (3, tm) stores (vs. 24 single-row stores before)
    out_ref[0:3, :] = conf
    out_ref[3:6, :] = ox
    out_ref[6:9, :] = oy
    out_ref[9:12, :] = bw
    out_ref[12:15, :] = bh
    out_ref[15:18, :] = cls
    out_ref[18:21, :] = jnp.broadcast_to(n_idx, cls.shape)


# ----------------------------- planning helpers -------------------------------
def _num_lane_blocks():
    # Two parallel lane blocks only pay off on multi-TensorCore chips (v7x);
    # on v5e/v6e the extra ~0.35us grid step is pure overhead.
    try:
        kind = jax.devices()[0].device_kind.lower()
    except Exception:
        return 1
    return 2 if "v7" in kind else 1


def _plan(n, h, w, nb):
    segs = [n * (h // s) * (w // s) for _, s in SCALES]
    m_total = sum(segs)
    align = 128 * nb
    m_pad = ((m_total + align - 1) // align) * align
    return segs, m_total, m_pad


def _build_metadata(n, h, w, m_pad):
    """Per-lane decode metadata, computed once on the host (shapes are static)."""
    meta = np.zeros((META_ROWS, m_pad), np.float32)
    meta[3, :] = -1.0                               # n_idx = -1 on padding lanes
    off = 0
    for key, stride in SCALES:
        hg, wg = h // stride, w // stride
        m_s = n * hg * wg
        idx = np.arange(m_s)
        meta[0, off:off + m_s] = float(stride)
        meta[1, off:off + m_s] = idx % wg           # w index
        meta[2, off:off + m_s] = (idx // wg) % hg   # h index
        meta[3, off:off + m_s] = idx // (wg * hg)   # image index
        meta[4, off:off + m_s] = 1.0                # valid
        for a, (a_w, a_h) in enumerate(ANCHORS_GROUP[key]):
            meta[5 + a, off:off + m_s] = a_w
            meta[8 + a, off:off + m_s] = a_h
        off += m_s
    return meta


# ----------------------------- synthetic "MyNet" + decode, one jitted graph ---
@functools.partial(jax.jit, static_argnames=("nb",))
def run_net_and_decode(x_nchw, params, meta, *, nb):
    n, c, h, w = x_nchw.shape
    segs, m_total, m_pad = _plan(n, h, w, nb)

    # TODO(synk): real MyNet backbone (checkpoint) is unknown; hierarchical strided average
    # pooling stands in for it.  The full-res input is read only once (stride-8 pool).
    p8 = x_nchw.reshape(n, c, h // 8, 8, w // 8, 8).mean(axis=(3, 5))      # stride-8 grid
    p16 = p8.reshape(n, c, h // 16, 2, w // 16, 2).mean(axis=(3, 5))       # stride-16 grid
    p32 = p16.reshape(n, c, h // 32, 2, w // 32, 2).mean(axis=(3, 5))      # stride-32 grid
    pooled = {8: p8, 16: p16, 32: p32}

    # concatenate all scales on the lane axis; expand each scale's head params per-lane so a
    # single kernel serves every scale with plain (27, tm) FMAs.
    x_parts, w_parts, b_parts = [], [], []
    for (key, stride), (w_f, b_f), m_s in zip(SCALES, params, segs):
        p = pooled[stride]
        x_parts.append(jnp.transpose(p, (1, 0, 2, 3)).reshape(c, m_s))
        w_parts.append(jnp.broadcast_to(w_f.T[:, :, None], (c, HEAD_CHANNELS, m_s)))
        b_parts.append(jnp.broadcast_to(b_f, (HEAD_CHANNELS, m_s)))

    pad = m_pad - m_total
    x_all = jnp.concatenate(x_parts + [jnp.zeros((c, pad), jnp.float32)], axis=1)
    w_all = jnp.concatenate(w_parts + [jnp.zeros((c, HEAD_CHANNELS, pad), jnp.float32)], axis=2)
    b_all = jnp.concatenate(b_parts + [jnp.zeros((HEAD_CHANNELS, pad), jnp.float32)], axis=1)

    tm = m_pad // nb
    return pl.pallas_call(
        _fused_head_decode_kernel,
        out_shape=jax.ShapeDtypeStruct((NUM_ANCHORS * OUT_FIELDS, m_pad), jnp.float32),
        grid=(nb,),
        in_specs=[
            pl.BlockSpec((c, tm), lambda i: (0, i)),                     # pooled features
            pl.BlockSpec((c, HEAD_CHANNELS, tm), lambda i: (0, 0, i)),   # per-lane weights
            pl.BlockSpec((HEAD_CHANNELS, tm), lambda i: (0, i)),         # per-lane bias
            pl.BlockSpec((META_ROWS, tm), lambda i: (0, i)),             # decode metadata
        ],
        out_specs=pl.BlockSpec((NUM_ANCHORS * OUT_FIELDS, tm), lambda i: (0, i)),
        compiler_params=pltpu.CompilerParams(dimension_semantics=("parallel",)),
    )(x_all, w_all, b_all, meta)


# ----------------------------- host-side NMS / grouping (plain numpy glue) -----
def _iou_center(box, boxes):
    x1, y1 = box[1] - box[3] / 2, box[2] - box[4] / 2
    x2, y2 = box[1] + box[3] / 2, box[2] + box[4] / 2
    X1, Y1 = boxes[:, 1] - boxes[:, 3] / 2, boxes[:, 2] - boxes[:, 4] / 2
    X2, Y2 = boxes[:, 1] + boxes[:, 3] / 2, boxes[:, 2] + boxes[:, 4] / 2
    iw = np.maximum(0.0, np.minimum(x2, X2) - np.maximum(x1, X1))
    ih = np.maximum(0.0, np.minimum(y2, Y2) - np.maximum(y1, Y1))
    inter = iw * ih
    union = box[3] * box[4] + boxes[:, 3] * boxes[:, 4] - inter
    return inter / np.maximum(union, 1e-9)


def nms(boxes, thr=0.3):
    boxes = boxes[boxes[:, 0].argsort()[::-1]]
    keep = []
    while boxes.shape[0] > 0:
        b = boxes[0]
        keep.append(b)
        if boxes.shape[0] == 1:
            break
        rest = boxes[1:]
        boxes = rest[_iou_center(b, rest) < thr]
    return keep


def my_detector_forward(x_nchw, thresh, params):
    n, _, h, w = x_nchw.shape
    nb = _num_lane_blocks()
    _, m_total, m_pad = _plan(n, h, w, nb)
    if nb > 1 and m_total < 512:          # not enough lanes to be worth two blocks
        nb = 1
        _, m_total, m_pad = _plan(n, h, w, nb)

    meta = jnp.asarray(_build_metadata(n, h, w, m_pad))
    dense = run_net_and_decode(x_nchw, params, meta, nb=nb)
    dense = np.asarray(jax.block_until_ready(dense))      # one sync, one transfer

    # threshold selection (mirrors `trans` mask + `convertOldImg` + torch.cat);
    # padding lanes carry conf = -inf so they can never be selected.
    det = dense.reshape(OUT_FIELDS, NUM_ANCHORS, -1)                    # (7, 3, M)
    det = np.transpose(det, (1, 2, 0)).reshape(-1, OUT_FIELDS)          # rows: [conf,ox,oy,w,h,cls,n]
    box_all = det[det[:, 0] > thresh]
    if box_all.shape[0] == 0:
        return np.array([])

    last_boxes = []
    for n_i in range(x_nchw.shape[0]):
        n_boxes = []
        boxes_n = box_all[box_all[:, 6] == n_i]
        for cls in range(CLASS_NUM):
            boxes_c = boxes_n[boxes_n[:, 5] == cls]
            if boxes_c.shape[0] > 0:
                n_boxes.extend(nms(boxes_c, 0.3))
        last_boxes.append(np.stack(n_boxes) if n_boxes else np.zeros((0, 7)))
    return last_boxes


# ----------------------------- main --------------------------------------------
if __name__ == "__main__":
    N, CIN, H, W = 2, 4, 128, 128          # 128x128 input -> 4x4 / 8x8 / 16x16 grids
    key = jax.random.PRNGKey(0)
    k_x, k_p = jax.random.split(key)
    x = jax.random.normal(k_x, (N, CIN, H, W), dtype=jnp.float32)

    # deterministic synthetic per-scale 1x1-conv heads, generated in the natural anchor-major
    # checkpoint layout and permuted ONCE on the host to field-major
    # ([conf x3, tx x3, ty x3, tw x3, th x3, cls0 x3, ..., cls3 x3]) for the kernel.
    params = []
    pkeys = jax.random.split(k_p, 3)
    for pk in pkeys:
        kw, kb = jax.random.split(pk)
        w_k = jax.random.normal(kw, (HEAD_CHANNELS, CIN), dtype=jnp.float32) * 0.5
        b_k = jax.random.normal(kb, (HEAD_CHANNELS, 1), dtype=jnp.float32) * 0.1
        params.append((w_k[FIELD_MAJOR_PERM, :], b_k[FIELD_MAJOR_PERM, :]))
    params = tuple(params)

    out = my_detector_forward(x, thresh=0.0, params=params)

    # sanity: detections exist and have 7 columns
    assert isinstance(out, list) and all(b.shape[1] == 7 for b in out if b.size)
    print("KERNEL_OK")
</pallas_src>

<mosaic_0001>
module attributes {stable_mosaic.version = 11 : i64} {
  func.func @_fused_head_decode_kernel(%arg0: i32, %arg1: memref<4x768xf32, #tpu.memory_space<vmem>>, %arg2: memref<4x27x768xf32, #tpu.memory_space<vmem>>, %arg3: memref<27x768xf32, #tpu.memory_space<vmem>>, %arg4: memref<11x768xf32, #tpu.memory_space<vmem>>, %arg5: memref<21x768xf32, #tpu.memory_space<vmem>>) attributes {dimension_semantics = [#tpu.dimension_semantics<parallel>], iteration_bounds = array<i64: 1>, scalar_prefetch = 0 : i64, scratch_operands = 0 : i64, tpu.core_type = #tpu.core_type<tc>, window_params = [{transform_indices = @transform_0, window_bounds = array<i64: 4, 768>}, {transform_indices = @transform_1, window_bounds = array<i64: 4, 27, 768>}, {transform_indices = @transform_2, window_bounds = array<i64: 27, 768>}, {transform_indices = @transform_3, window_bounds = array<i64: 11, 768>}, {transform_indices = @transform_4, window_bounds = array<i64: 21, 768>}]} {
    %c0 = arith.constant 0 : index
    %c0_0 = arith.constant 0 : index
    %0 = vector.load %arg1[%c0, %c0_0] : memref<4x768xf32, #tpu.memory_space<vmem>>, vector<4x768xf32>
    %c0_1 = arith.constant 0 : index
    %c0_2 = arith.constant 0 : index
    %1 = vector.load %arg3[%c0_1, %c0_2] : memref<27x768xf32, #tpu.memory_space<vmem>>, vector<27x768xf32>
    %c0_3 = arith.constant 0 : index
    %c0_4 = arith.constant 0 : index
    %c0_5 = arith.constant 0 : index
    %2 = vector.load %arg2[%c0_3, %c0_4, %c0_5] : memref<4x27x768xf32, #tpu.memory_space<vmem>>, vector<1x27x768xf32>
    %3 = vector.shape_cast %2 : vector<1x27x768xf32> to vector<27x768xf32>
    %4 = vector.extract_strided_slice %0 {offsets = [0, 0], sizes = [1, 768], strides = [1, 1]} : vector<4x768xf32> to vector<1x768xf32>
    %5 = vector.broadcast %4 : vector<1x768xf32> to vector<27x768xf32>
    %6 = arith.mulf %3, %5 : vector<27x768xf32>
    %7 = arith.addf %1, %6 : vector<27x768xf32>
    %c1 = arith.constant 1 : index
    %c0_6 = arith.constant 0 : index
    %c0_7 = arith.constant 0 : index
    %8 = vector.load %arg2[%c1, %c0_6, %c0_7] : memref<4x27x768xf32, #tpu.memory_space<vmem>>, vector<1x27x768xf32>
    %9 = vector.shape_cast %8 : vector<1x27x768xf32> to vector<27x768xf32>
    %10 = vector.extract_strided_slice %0 {offsets = [1, 0], sizes = [1, 768], strides = [1, 1]} : vector<4x768xf32> to vector<1x768xf32>
    %11 = vector.broadcast %10 : vector<1x768xf32> to vector<27x768xf32>
    %12 = arith.mulf %9, %11 : vector<27x768xf32>
    %13 = arith.addf %7, %12 : vector<27x768xf32>
    %c2 = arith.constant 2 : index
    %c0_8 = arith.constant 0 : index
    %c0_9 = arith.constant 0 : index
    %14 = vector.load %arg2[%c2, %c0_8, %c0_9] : memref<4x27x768xf32, #tpu.memory_space<vmem>>, vector<1x27x768xf32>
    %15 = vector.shape_cast %14 : vector<1x27x768xf32> to vector<27x768xf32>
    %16 = vector.extract_strided_slice %0 {offsets = [2, 0], sizes = [1, 768], strides = [1, 1]} : vector<4x768xf32> to vector<1x768xf32>
    %17 = vector.broadcast %16 : vector<1x768xf32> to vector<27x768xf32>
    %18 = arith.mulf %15, %17 : vector<27x768xf32>
    %19 = arith.addf %13, %18 : vector<27x768xf32>
    %c3 = arith.constant 3 : index
    %c0_10 = arith.constant 0 : index
    %c0_11 = arith.constant 0 : index
    %20 = vector.load %arg2[%c3, %c0_10, %c0_11] : memref<4x27x768xf32, #tpu.memory_space<vmem>>, vector<1x27x768xf32>
    %21 = vector.shape_cast %20 : vector<1x27x768xf32> to vector<27x768xf32>
    %22 = vector.extract_strided_slice %0 {offsets = [3, 0], sizes = [1, 768], strides = [1, 1]} : vector<4x768xf32> to vector<1x768xf32>
    %23 = vector.broadcast %22 : vector<1x768xf32> to vector<27x768xf32>
    %24 = arith.mulf %21, %23 : vector<27x768xf32>
    %25 = arith.addf %19, %24 : vector<27x768xf32>
    %c0_12 = arith.constant 0 : index
    %c0_13 = arith.constant 0 : index
    %26 = vector.load %arg4[%c0_12, %c0_13] : memref<11x768xf32, #tpu.memory_space<vmem>>, vector<1x768xf32>
    %c1_14 = arith.constant 1 : index
    %c0_15 = arith.constant 0 : index
    %27 = vector.load %arg4[%c1_14, %c0_15] : memref<11x768xf32, #tpu.memory_space<vmem>>, vector<1x768xf32>
    %c2_16 = arith.constant 2 : index
    %c0_17 = arith.constant 0 : index
    %28 = vector.load %arg4[%c2_16, %c0_17] : memref<11x768xf32, #tpu.memory_space<vmem>>, vector<1x768xf32>
    %c3_18 = arith.constant 3 : index
    %c0_19 = arith.constant 0 : index
    %29 = vector.load %arg4[%c3_18, %c0_19] : memref<11x768xf32, #tpu.memory_space<vmem>>, vector<1x768xf32>
    %c4 = arith.constant 4 : index
    %c0_20 = arith.constant 0 : index
    %30 = vector.load %arg4[%c4, %c0_20] : memref<11x768xf32, #tpu.memory_space<vmem>>, vector<1x768xf32>
    %c5 = arith.constant 5 : index
    %c0_21 = arith.constant 0 : index
    %31 = vector.load %arg4[%c5, %c0_21] : memref<11x768xf32, #tpu.memory_space<vmem>>, vector<3x768xf32>
    %c8 = arith.constant 8 : index
    %c0_22 = arith.constant 0 : index
    %32 = vector.load %arg4[%c8, %c0_22] : memref<11x768xf32, #tpu.memory_space<vmem>>, vector<3x768xf32>
    %cst = arith.constant 5.000000e-01 : f32
    %33 = vector.broadcast %cst : f32 to vector<1x768xf32>
    %34 = arith.cmpf ogt, %30, %33 : vector<1x768xf32>
    %35 = vector.extract_strided_slice %25 {offsets = [0, 0], sizes = [3, 768], strides = [1, 1]} : vector<27x768xf32> to vector<3x768xf32>
    %cst_23 = arith.constant 0xFF800000 : f32
    %36 = vector.shape_cast %34 : vector<1x768xi1> to vector<1x768xi1>
    %37 = vector.broadcast %36 : vector<1x768xi1> to vector<3x768xi1>
    %38 = vector.broadcast %cst_23 : f32 to vector<3x768xf32>
    %39 = arith.select %37, %35, %38 : vector<3x768xi1>, vector<3x768xf32>
    %40 = vector.extract_strided_slice %25 {offsets = [3, 0], sizes = [3, 768], strides = [1, 1]} : vector<27x768xf32> to vector<3x768xf32>
    %41 = vector.extract_strided_slice %25 {offsets = [6, 0], sizes = [3, 768], strides = [1, 1]} : vector<27x768xf32> to vector<3x768xf32>
    %42 = vector.extract_strided_slice %25 {offsets = [9, 0], sizes = [3, 768], strides = [1, 1]} : vector<27x768xf32> to vector<3x768xf32>
    %43 = vector.extract_strided_slice %25 {offsets = [12, 0], sizes = [3, 768], strides = [1, 1]} : vector<27x768xf32> to vector<3x768xf32>
    %44 = vector.broadcast %27 : vector<1x768xf32> to vector<3x768xf32>
    %45 = arith.addf %44, %40 : vector<3x768xf32>
    %46 = vector.broadcast %26 : vector<1x768xf32> to vector<3x768xf32>
    %47 = arith.mulf %45, %46 : vector<3x768xf32>
    %48 = vector.broadcast %28 : vector<1x768xf32> to vector<3x768xf32>
    %49 = arith.addf %48, %41 : vector<3x768xf32>
    %50 = vector.broadcast %26 : vector<1x768xf32> to vector<3x768xf32>
    %51 = arith.mulf %49, %50 : vector<3x768xf32>
    %52 = math.exp %42 : vector<3x768xf32>
    %53 = arith.mulf %52, %31 : vector<3x768xf32>
    %54 = math.exp %43 : vector<3x768xf32>
    %55 = arith.mulf %54, %32 : vector<3x768xf32>
    %56 = vector.extract_strided_slice %25 {offsets = [15, 0], sizes = [3, 768], strides = [1, 1]} : vector<27x768xf32> to vector<3x768xf32>
    %cst_24 = arith.constant 0.000000e+00 : f32
    %57 = vector.broadcast %cst_24 : f32 to vector<3x768xf32>
    %58 = vector.extract_strided_slice %25 {offsets = [18, 0], sizes = [3, 768], strides = [1, 1]} : vector<27x768xf32> to vector<3x768xf32>
    %59 = arith.cmpf ogt, %58, %56 : vector<3x768xf32>
    %cst_25 = arith.constant 1.000000e+00 : f32
    %60 = vector.broadcast %cst_25 : f32 to vector<3x768xf32>
    %61 = arith.select %59, %60, %57 : vector<3x768xi1>, vector<3x768xf32>
    %62 = arith.maximumf %56, %58 : vector<3x768xf32>
    %63 = vector.extract_strided_slice %25 {offsets = [21, 0], sizes = [3, 768], strides = [1, 1]} : vector<27x768xf32> to vector<3x768xf32>
    %64 = arith.cmpf ogt, %63, %62 : vector<3x768xf32>
    %cst_26 = arith.constant 2.000000e+00 : f32
    %65 = vector.broadcast %cst_26 : f32 to vector<3x768xf32>
    %66 = arith.select %64, %65, %61 : vector<3x768xi1>, vector<3x768xf32>
    %67 = arith.maximumf %62, %63 : vector<3x768xf32>
    %68 = vector.extract_strided_slice %25 {offsets = [24, 0], sizes = [3, 768], strides = [1, 1]} : vector<27x768xf32> to vector<3x768xf32>
    %69 = arith.cmpf ogt, %68, %67 : vector<3x768xf32>
    %cst_27 = arith.constant 3.000000e+00 : f32
    %70 = vector.broadcast %cst_27 : f32 to vector<3x768xf32>
    %71 = arith.select %69, %70, %66 : vector<3x768xi1>, vector<3x768xf32>
    %c0_28 = arith.constant 0 : index
    %c0_29 = arith.constant 0 : index
    %72 = vector.load %arg5[%c0_28, %c0_29] : memref<21x768xf32, #tpu.memory_space<vmem>>, vector<3x768xf32>
    tpu.vector_store %arg5[%c0_28, %c0_29], %39 {strides = array<i32>} : memref<21x768xf32, #tpu.memory_space<vmem>>, vector<3x768xf32>,
    %c3_30 = arith.constant 3 : index
    %c0_31 = arith.constant 0 : index
    %73 = vector.load %arg5[%c3_30, %c0_31] : memref<21x768xf32, #tpu.memory_space<vmem>>, vector<3x768xf32>
    tpu.vector_store %arg5[%c3_30, %c0_31], %47 {strides = array<i32>} : memref<21x768xf32, #tpu.memory_space<vmem>>, vector<3x768xf32>,
    %c6 = arith.constant 6 : index
    %c0_32 = arith.constant 0 : index
    %74 = vector.load %arg5[%c6, %c0_32] : memref<21x768xf32, #tpu.memory_space<vmem>>, vector<3x768xf32>
    tpu.vector_store %arg5[%c6, %c0_32], %51 {strides = array<i32>} : memref<21x768xf32, #tpu.memory_space<vmem>>, vector<3x768xf32>,
    %c9 = arith.constant 9 : index
    %c0_33 = arith.constant 0 : index
    %75 = vector.load %arg5[%c9, %c0_33] : memref<21x768xf32, #tpu.memory_space<vmem>>, vector<3x768xf32>
    tpu.vector_store %arg5[%c9, %c0_33], %53 {strides = array<i32>} : memref<21x768xf32, #tpu.memory_space<vmem>>, vector<3x768xf32>,
    %c12 = arith.constant 12 : index
    %c0_34 = arith.constant 0 : index
    %76 = vector.load %arg5[%c12, %c0_34] : memref<21x768xf32, #tpu.memory_space<vmem>>, vector<3x768xf32>
    tpu.vector_store %arg5[%c12, %c0_34], %55 {strides = array<i32>} : memref<21x768xf32, #tpu.memory_space<vmem>>, vector<3x768xf32>,
    %c15 = arith.constant 15 : index
    %c0_35 = arith.constant 0 : index
    %77 = vector.load %arg5[%c15, %c0_35] : memref<21x768xf32, #tpu.memory_space<vmem>>, vector<3x768xf32>
    tpu.vector_store %arg5[%c15, %c0_35], %71 {strides = array<i32>} : memref<21x768xf32, #tpu.memory_space<vmem>>, vector<3x768xf32>,
    %78 = vector.shape_cast %29 : vector<1x768xf32> to vector<1x768xf32>
    %79 = vector.broadcast %78 : vector<1x768xf32> to vector<3x768xf32>
    %c18 = arith.constant 18 : index
    %c0_36 = arith.constant 0 : index
    %80 = vector.load %arg5[%c18, %c0_36] : memref<21x768xf32, #tpu.memory_space<vmem>>, vector<3x768xf32>
    tpu.vector_store %arg5[%c18, %c0_36], %79 {strides = array<i32>} : memref<21x768xf32, #tpu.memory_space<vmem>>, vector<3x768xf32>,
    return
  }
  func.func @transform_0(%arg0: i32) -> (i32, i32) {
    %c0_i32 = arith.constant 0 : i32
    %c0_i32_0 = arith.constant 0 : i32
    return %c0_i32, %arg0 : i32, i32
  }
  func.func @transform_1(%arg0: i32) -> (i32, i32, i32) {
    %c0_i32 = arith.constant 0 : i32
    %c0_i32_0 = arith.constant 0 : i32
    %c0_i32_1 = arith.constant 0 : i32
    return %c0_i32, %c0_i32_0, %arg0 : i32, i32, i32
  }
  func.func @transform_2(%arg0: i32) -> (i32, i32) {
    %c0_i32 = arith.constant 0 : i32
    %c0_i32_0 = arith.constant 0 : i32
    return %c0_i32, %arg0 : i32, i32
  }
  func.func @transform_3(%arg0: i32) -> (i32, i32) {
    %c0_i32 = arith.constant 0 : i32
    %c0_i32_0 = arith.constant 0 : i32
    return %c0_i32, %arg0 : i32, i32
  }
  func.func @transform_4(%arg0: i32) -> (i32, i32) {
    %c0_i32 = arith.constant 0 : i32
    %c0_i32_0 = arith.constant 0 : i32
    return %c0_i32, %arg0 : i32, i32
  }
}

</mosaic_0001>

<bundles_post_ra>
// kernel: run_net_and_decode.1
= control target key start
LH: loop header
LB: loop body
LE: loop exit
PB: predicated region body
PF: predicated region fallthrough
CT: control target
= control target key end

     0   :  { %v72_v0 = vlaneseq  ;;  %v1282_v48 = vmov 0   ;;  %s2354_s0 = inlined_call_operand.vmem [shape: f32[4,768], index: 0, kind: input, shape index: {}]   ;;  %s2355_s1 = inlined_call_operand.vmem [shape: f32[4,27,768], index: 1, kind: input, shape index: {}]   ;;  %s2356_s2 = inlined_call_operand.vmem [shape: f32[27,768], index: 2, kind: input, shape index: {}]   ;;  %s2357_s3 = inlined_call_operand.vmem [shape: f32[11,768], index: 3, kind: input, shape index: {}]   ;;  %s2358_s4 = inlined_call_operand.hbm [shape: f32[21,768], index: 4, kind: output, shape index: {}]  }
   0x1   :  { %v1315_v2 = vld [vmem:[%s2354_s0] sm:$0xff]  ;;  %v46_v32 = vld [vmem:[%s2355_s1 + $0x8] sm:$0xff]  ;;  %v1177_v31 = vld [vmem:[%s2355_s1 + $0x130] sm:$0xff] }
   0x2   :  { %v73_v1 = vshrl.u32 %v72_v0, 7  ;;  %v1241_v3 = vld [vmem:[%s2357_s3 + $0x4] ss:$8 sm:$0xf] }
   0x3   :  { %v1242_v8 = vld [vmem:[%s2357_s3 + $0x4] ss:$8 sm:$0x30] }
   0x4   :  { %v1320_v4 = vsub.s32 0, %v73_v1  ;;  %v1322_v5 = vsub.s32 1, %v73_v1  ;;  %v1324_v6 = vsub.s32 2, %v73_v1  ;;  %v1326_v7 = vsub.s32 3, %v73_v1  ;;  %v45_v10 = vld [vmem:[%s2355_s1] sm:$0xff]  ;;  %v58_v33 = vld [vmem:[%s2355_s1 + $0x68] sm:$0xff] }
   0x5   :  { %v1331_v9 = vsub.s32 4, %v73_v1  ;;  %v57_v11 = vld [vmem:[%s2355_s1 + $0x60] sm:$0xff]  ;;  %v573_v19 = vor.u32 %v1242_v8, %v1241_v3  ;;  %v1358_v21 = vsub.s32 5, %v73_v1  ;;  %v1360_v22 = vsub.s32 6, %v73_v1  ;;  %v22_v45 = vld [vmem:[%s2356_s2 + $0x8] sm:$0xff] }
   0x6   :  { %2371 = vst [vmem:[#allocation5_spill] sm:$0xff] %v1320_v4  ;;  %2372 = vst [vmem:[#allocation6_spill] sm:$0xff] %v1322_v5  ;;  %v75_v12 = vrot.slane %v1315_v2, %v1320_v4  ;;  %v202_v13 = vrot.slane %v1315_v2, %v1322_v5  ;;  %v329_v14 = vrot.slane %v1315_v2, %v1324_v6  ;;  %v1163_v16 = vld [vmem:[%s2355_s1 + $0xc0] sm:$0xff]  ;;  %v1425_v46 = vld [vmem:[%s2354_s0 + $0x8] sm:$0xff]  ;;  %v1455_v59 = vsub.s32 7, %v73_v1 }
   0x7   :  { %2373 = vst [vmem:[#allocation7_spill] sm:$0xff] %v1324_v6  ;;  %2374 = vst [vmem:[#allocation8_spill] sm:$0xff] %v1326_v7  ;;  %v456_v15 = vrot.slane %v1315_v2, %v1326_v7  ;;  %v1175_v17 = vld [vmem:[%s2355_s1 + $0x120] sm:$0xff]  ;;  %v79_v20 = vrot.slane %v1315_v2, %v1331_v9  ;;  %vm1386_vm0 = vcmp.gt.f32.partialorder %v573_v19, 0.5  ;;  %v206_v35 = vrot.slane %v1315_v2, %v1358_v21  ;;  %v1164_v52 = vld [vmem:[%s2355_s1 + $0xc8] sm:$0xff] }
   0x8   :  { %2375 = vst [vmem:[#allocation9_spill] sm:$0xff] %v1331_v9  ;;  %v1187_v18 = vld [vmem:[%s2355_s1 + $0x180] sm:$0xff]  ;;  %2376 = vst [vmem:[#allocation10_spill] sm:$0xff] %v1358_v21  ;;  %v1363_v23 = vrot.slane %v75_v12, %v1320_v4  ;;  %v1366_v24 = vrot.slane %v202_v13, %v1322_v5  ;;  %v1372_v26 = vrot.slane %v329_v14, %v1324_v6  ;;  %v1429_v49 = vsel %vm1386_vm0, 1, %v1282_v48  ;;  %v1176_v53 = vld [vmem:[%s2355_s1 + $0x128] sm:$0xff] }
   0x9   :  { %v1199_v25 = vld [vmem:[%s2355_s1 + $0x1e0] sm:$0xff]  ;;  %v1381_v29 = vrot.slane %v456_v15, %v1326_v7  ;;  %v1397_v34 = vrot.slane %v79_v20, %v1320_v4  ;;  %v333_v36 = vrot.slane %v1315_v2, %v1360_v22  ;;  %v1188_v54 = vld [vmem:[%s2355_s1 + $0x188] sm:$0xff]  ;;  %v591_v55 = vrot.slane %v1429_v49, %v1320_v4  ;;  %v47_v14 = vld [vmem:[%s2355_s1 + $0x10] sm:$0xff] }
   0xa   :  { %v1211_v27 = vld [vmem:[%s2355_s1 + $0x240] sm:$0xff]  ;;  %v126_v37 = vmul.f32 %v1363_v23, %v45_v10  ;;  %v1405_v38 = vmul.f32 %v1363_v23, %v57_v11  ;;  %v253_v39 = vmul.f32 %v1163_v16, %v1366_v24  ;;  %v1409_v40 = vmul.f32 %v1175_v17, %v1366_v24  ;;  %v1200_v57 = vld [vmem:[%s2355_s1 + $0x1e8] sm:$0xff]  ;;  %v59_v15 = vld [vmem:[%s2355_s1 + $0x70] sm:$0xff] }
   0xb   :  { %v1223_v28 = vld [vmem:[%s2355_s1 + $0x2a0] sm:$0xff]  ;;  %v380_v41 = vmul.f32 %v1187_v18, %v1372_v26  ;;  %v1413_v42 = vmul.f32 %v1199_v25, %v1372_v26  ;;  %v507_v43 = vmul.f32 %v1211_v27, %v1381_v29  ;;  %v127_v50 = vmul.f32 %v1397_v34, %v46_v32  ;;  %v1212_v17 = vld [vmem:[%s2355_s1 + $0x248] sm:$0xff] }
   0xc   :  { %v21_v30 = vld [vmem:[%s2356_s2] sm:$0xff]  ;;  %v1417_v44 = vmul.f32 %v1223_v28, %v1381_v29  ;;  %v1433_v51 = vmul.f32 %v1397_v34, %v58_v33  ;;  %v1447_v56 = vrot.slane %v206_v35, %v1322_v5  ;;  %v1453_v58 = vrot.slane %v333_v36, %v1324_v6  ;;  %v23_v28 = vld [vmem:[%s2356_s2 + $0x10] sm:$0xff] }
   0xd   :  { %2379 = vst [vmem:[#allocation11_spill] sm:$0xff] %v1413_v42  ;;  %v150_v47 = vadd.f32 %v126_v37, %v21_v30  ;;  %v151_v61 = vadd.f32 %v127_v50, %v22_v45  ;;  %v595_v62 = vrot.slane %v1429_v49, %v1322_v5  ;;  %v83_v63 = vrot.slane %v1425_v46, %v1320_v4  ;;  %v1165_v30 = vld [vmem:[%s2355_s1 + $0xd0] sm:$0xff] }
   0xe   :  { %2380 = vst [vmem:[#allocation12_spill] sm:$0xff] %v1417_v44  ;;  %vm1461_vm1 = vcmp.eq.s32.totalorder %v591_v55, 1  ;;  %v254_v3 = vmul.f32 %v1164_v52, %v1447_v56  ;;  %v1467_v8 = vmul.f32 %v1176_v53, %v1447_v56  ;;  %v381_v1 = vmul.f32 %v1188_v54, %v1453_v58  ;;  %v1213_v52 = vld [vmem:[%s2355_s1 + $0x250] sm:$0xff] }
   0xf   :  { %v277_v60 = vadd.f32 %v253_v39, %v150_v47  ;;  %v1471_v11 = vmul.f32 %v1200_v57, %v1453_v58  ;;  %v460_v12 = vrot.slane %v1315_v2, %v1455_v59  ;;  %vm1475_vm2 = vcmp.eq.s32.totalorder %v595_v62, 1  ;;  %v1224_v2 = vld [vmem:[%s2355_s1 + $0x2a8] sm:$0xff]  ;;  %v1225_v53 = vld [vmem:[%s2355_s1 + $0x2b0] sm:$0xff] }
  0x10   :  { %2383 = vst [vmem:[#allocation13_spill] sm:$0xff] %v1467_v8  ;;  %v278_v16 = vadd.f32 %v254_v3, %v151_v61  ;;  %v1492_v18 = vrot.slane %v83_v63, %v1320_v4  ;;  %v210_v19 = vrot.slane %v1425_v46, %v1322_v5  ;;  %v337_v20 = vrot.slane %v1425_v46, %v1324_v6  ;;  %v1565_v3 = vld [vmem:[%s2354_s0 + $0x10] sm:$0xff] }
  0x11   :  { %v404_v10 = vadd.f32 %v380_v41, %v277_v60  ;;  %2384 = vst [vmem:[#allocation14_spill] sm:$0xff] %v1471_v11  ;;  %v1501_v27 = vrot.slane %v460_v12, %v1326_v7  ;;  %v464_v32 = vrot.slane %v1425_v46, %v1326_v7  ;;  %v599_v33 = vrot.slane %v1429_v49, %v1324_v6  ;;  %v1189_v41 = vld [vmem:[%s2355_s1 + $0x190] sm:$0xff] }
  0x12   :  { %v405_v35 = vadd.f32 %v381_v1, %v278_v16  ;;  %v128_v36 = vmul.f32 %v1492_v18, %v47_v14  ;;  %v1518_v37 = vmul.f32 %v1492_v18, %v59_v15  ;;  %v1521_v39 = vrot.slane %v210_v19, %v1322_v5  ;;  %v48_v16 = vld [vmem:[%s2355_s1 + $0x18] sm:$0xff] }
  0x13   :  { %v1498_v25 = vadd.f32 %v507_v43, %v404_v10  ;;  %v1201_v43 = vld [vmem:[%s2355_s1 + $0x1f0] sm:$0xff]  ;;  %v508_v47 = vmul.f32 %v1212_v17, %v1501_v27  ;;  %v1534_v48 = vmul.f32 %v1224_v2, %v1501_v27  ;;  %v1537_v50 = vrot.slane %v337_v20, %v1324_v6  ;;  %v60_v17 = vld [vmem:[%s2355_s1 + $0x78] sm:$0xff] }
  0x14   :  { %2387 = vst [vmem:[#allocation15_spill] sm:$0xff] %v1518_v37  ;;  %v152_v54 = vadd.f32 %v128_v36, %v23_v28  ;;  %v255_v55 = vmul.f32 %v1165_v30, %v1521_v39  ;;  %v1547_v57 = vmul.f32 %v1177_v31, %v1521_v39  ;;  %v1550_v60 = vrot.slane %v464_v32, %v1326_v7  ;;  %v1166_v2 = vld [vmem:[%s2355_s1 + $0xd8] sm:$0xff]  ;;  %v556_v37 = vld [vmem:[%s2357_s3] ss:$8 sm:$0x30] }
  0x15   :  { %v618_v45 = vsel %vm1461_vm1, %v1498_v25, -inf  ;;  %2388 = vst [vmem:[#allocation16_spill] sm:$0xff] %v1534_v48  ;;  %2389 = vst [vmem:[#allocation17_spill] sm:$0xff] %v1537_v50  ;;  %v1552_v61 = vadd.f32 %v508_v47, %v405_v35  ;;  %v382_v62 = vmul.f32 %v1189_v41, %v1537_v50  ;;  %v1556_v63 = vmul.f32 %v1201_v43, %v1537_v50  ;;  %v1178_v31 = vld [vmem:[%s2355_s1 + $0x138] sm:$0xff]  ;;  %v1192_v48 = vld [vmem:[%s2355_s1 + $0x1a8] sm:$0xff] }
  0x16   :  { %1044 = vst [vmem:[#allocation2] sm:$0x7] %v618_v45  ;;  %2390 = vst [vmem:[#allocation18_spill] sm:$0xff] %v1547_v57  ;;  %vm1558_vm3 = vcmp.eq.s32.totalorder %v599_v33, 1  ;;  %v279_v1 = vadd.f32 %v255_v55, %v152_v54  ;;  %v509_v10 = vmul.f32 %v1213_v52, %v1550_v60  ;;  %v1569_v12 = vmul.f32 %v1225_v53, %v1550_v60  ;;  %v1190_v32 = vld [vmem:[%s2355_s1 + $0x198] sm:$0xff]  ;;  %v1204_v57 = vld [vmem:[%s2355_s1 + $0x208] sm:$0xff] }
  0x17   :  { %2391 = vst [vmem:[#allocation19_spill] sm:$0xff] %v1550_v60  ;;  %2392 = vst [vmem:[#allocation20_spill] sm:$0xff] %v1556_v63  ;;  %v87_v14 = vrot.slane %v1425_v46, %v1331_v9  ;;  %v619_v15 = vsel %vm1475_vm2, %v1552_v61, -inf  ;;  %v214_v19 = vrot.slane %v1425_v46, %v1358_v21  ;;  %v341_v20 = vrot.slane %v1425_v46, %v1360_v22  ;;  %v1202_v33 = vld [vmem:[%s2355_s1 + $0x1f8] sm:$0xff] }
  0x18   :  { %2395 = vst [vmem:[#allocation21_spill] sm:$0xff] %v1569_v12  ;;  %v468_v13 = vrot.slane %v1425_v46, %v1455_v59  ;;  %1045 = vst [vmem:[#allocation2 + $0x8] sm:$0x7] %v619_v15  ;;  %v406_v28 = vadd.f32 %v382_v62, %v279_v1  ;;  %v603_v46 = vrot.slane %v1429_v49, %v1326_v7  ;;  %v24_v36 = vld [vmem:[%s2356_s2 + $0x18] sm:$0xff] }
  0x19   :  { %v1592_v30 = vrot.slane %v87_v14, %v1320_v4  ;;  %v91_v35 = vrot.slane %v1565_v3, %v1320_v4  ;;  %v1611_v41 = vrot.slane %v214_v19, %v1322_v5  ;;  %v1614_v43 = vrot.slane %v341_v20, %v1324_v6  ;;  %v1214_v45 = vld [vmem:[%s2355_s1 + $0x258] sm:$0xff] }
  0x1a   :  { %v1226_v47 = vld [vmem:[%s2355_s1 + $0x2b8] sm:$0xff]  ;;  %v1623_v52 = vrot.slane %v468_v13, %v1326_v7  ;;  %v218_v53 = vrot.slane %v1565_v3, %v1322_v5  ;;  %v1627_v54 = vadd.f32 %v509_v10, %v406_v28  ;;  %vm1633_vm4 = vcmp.eq.s32.totalorder %v603_v46, 1  ;;  %v49_v10 = vld [vmem:[%s2355_s1 + $0x20] sm:$0xff] }
  0x1b   :  { %2396 = vst [vmem:[#allocation22_spill] sm:$0xff] %v1592_v30  ;;  %2397 = vst [vmem:[#allocation23_spill] sm:$0xff] %v1611_v41  ;;  %v129_v55 = vmul.f32 %v1592_v30, %v48_v16  ;;  %v1631_v62 = vmul.f32 %v1592_v30, %v60_v17  ;;  %v256_v14 = vmul.f32 %v1166_v2, %v1611_v41  ;;  %v61_v28 = vld [vmem:[%s2355_s1 + $0x80] sm:$0xff] }
  0x1c   :  { %v1639_v15 = vmul.f32 %v1178_v31, %v1611_v41  ;;  %v383_v19 = vmul.f32 %v1190_v32, %v1614_v43  ;;  %v1643_v20 = vmul.f32 %v1202_v33, %v1614_v43  ;;  %v620_v16 = vsel %vm1558_vm3, %v1627_v54, -inf  ;;  %v1167_v31 = vld [vmem:[%s2355_s1 + $0xe0] sm:$0xff] }
  0x1d   :  { %2398 = vst [vmem:[#allocation24_spill] sm:$0xff] %v1631_v62  ;;  %v153_v17 = vadd.f32 %v129_v55, %v24_v36  ;;  %v510_v13 = vmul.f32 %v1214_v45, %v1623_v52  ;;  %v1653_v2 = vmul.f32 %v1226_v47, %v1623_v52  ;;  %v1179_v32 = vld [vmem:[%s2355_s1 + $0x140] sm:$0xff]  ;;  %1046 = vst [vmem:[#allocation2 + $0x10] sm:$0x7] %v620_v16 }
  0x1e   :  { %2401 = vst [vmem:[#allocation25_spill] sm:$0xff] %v1639_v15  ;;  %2402 = vst [vmem:[#allocation26_spill] sm:$0xff] %v1643_v20  ;;  %v1665_v0 = vrot.slane %v91_v35, %v1320_v4  ;;  %v1668_v33 = vrot.slane %v218_v53, %v1322_v5  ;;  %v345_v46 = vrot.slane %v1565_v3, %v1324_v6  ;;  %v25_v47 = vld [vmem:[%s2356_s2 + $0x20] sm:$0xff] }
  0x1f   :  { %2403 = vst [vmem:[#allocation27_spill] sm:$0xff] %v1653_v2  ;;  %v472_v36 = vrot.slane %v1565_v3, %v1326_v7  ;;  %v280_v45 = vadd.f32 %v256_v14, %v153_v17  ;;  %v1191_v55 = vld [vmem:[%s2355_s1 + $0x1a0] sm:$0xff]  ;;  %v607_v35 = vrot.slane %v1429_v49, %v1331_v9  ;;  %v95_v53 = vrot.slane %v1565_v3, %v1331_v9 }
  0x20   :  { %2404 = vst [vmem:[#allocation28_spill] sm:$0xff] %v1665_v0  ;;  %2405 = vst [vmem:[#allocation29_spill] sm:$0xff] %v1668_v33  ;;  %v222_v16 = vrot.slane %v1565_v3, %v1358_v21  ;;  %v130_v2 = vmul.f32 %v1665_v0, %v49_v10  ;;  %v1688_v14 = vmul.f32 %v1665_v0, %v61_v28  ;;  %v1203_v15 = vld [vmem:[%s2355_s1 + $0x200] sm:$0xff] }
  0x21   :  { %v257_v17 = vmul.f32 %v1167_v31, %v1668_v33  ;;  %v1692_v20 = vmul.f32 %v1179_v32, %v1668_v33  ;;  %v1215_v62 = vld [vmem:[%s2355_s1 + $0x260] sm:$0xff]  ;;  %v407_v12 = vadd.f32 %v383_v19, %v280_v45  ;;  %v1704_v28 = vrot.slane %v345_v46, %v1324_v6  ;;  %v62_v19 = vld [vmem:[%s2355_s1 + $0x88] sm:$0xff]  ;;  %v51_v32 = vld [vmem:[%s2355_s1 + $0x30] sm:$0xff] }
  0x22   :  { %2406 = vst [vmem:[#allocation30_spill] sm:$0xff] %v1688_v14  ;;  %v1227_v10 = vld [vmem:[%s2355_s1 + $0x2c0] sm:$0xff]  ;;  %v1707_v31 = vrot.slane %v472_v36, %v1326_v7  ;;  %vm1709_vm5 = vcmp.eq.s32.totalorder %v607_v35, 1  ;;  %v50_v14 = vld [vmem:[%s2355_s1 + $0x28] sm:$0xff]  ;;  %v154_v36 = vadd.f32 %v130_v2, %v25_v47  ;;  %v1726_v45 = vrot.slane %v95_v53, %v1320_v4 }
  0x23   :  { %2407 = vst [vmem:[#allocation31_spill] sm:$0xff] %v1692_v20  ;;  %v26_v20 = vld [vmem:[%s2356_s2 + $0x28] sm:$0xff]  ;;  %v1732_v63 = vrot.slane %v222_v16, %v1322_v5  ;;  %v349_v2 = vrot.slane %v1565_v3, %v1360_v22  ;;  %v1742_v47 = vadd.f32 %v510_v13, %v407_v12  ;;  %v384_v53 = vmul.f32 %v1191_v55, %v1704_v28 }
  0x24   :  { %v1168_v46 = vld [vmem:[%s2355_s1 + $0xe8] sm:$0xff]  ;;  %v1746_v11 = vmul.f32 %v1203_v15, %v1704_v28  ;;  %v511_v16 = vmul.f32 %v1215_v62, %v1707_v31  ;;  %v281_v8 = vadd.f32 %v257_v17, %v154_v36  ;;  %v1756_v22 = vmul.f32 %v1227_v10, %v1707_v31 }
  0x25   :  { %v1180_v35 = vld [vmem:[%s2355_s1 + $0x148] sm:$0xff]  ;;  %v131_v12 = vmul.f32 %v1726_v45, %v50_v14  ;;  %v1760_v13 = vmul.f32 %v1726_v45, %v62_v19  ;;  %v621_v55 = vsel %vm1633_vm4, %v1742_v47, -inf  ;;  %v258_v17 = vmul.f32 %v1168_v46, %v1732_v63 }
  0x26   :  { %2410 = vst [vmem:[#allocation32_spill] sm:$0xff] %v1746_v11  ;;  %v555_v44 = vld [vmem:[%s2357_s3] ss:$8 sm:$0xf]  ;;  %2411 = vst [vmem:[#allocation33_spill] sm:$0xff] %v1756_v22  ;;  %v1773_v10 = vmul.f32 %v1180_v35, %v1732_v63  ;;  %v1776_v14 = vrot.slane %v349_v2, %v1324_v6  ;;  %v408_v19 = vadd.f32 %v384_v53, %v281_v8 }
  0x27   :  { %2412 = vst [vmem:[#allocation34_spill] sm:$0xff] %v1760_v13  ;;  %v1235_v62 = vld [vmem:[%s2357_s3 + $0x1] ss:$8 sm:$0xf]  ;;  %1047 = vst [vmem:[#allocation2 + $0x18] sm:$0x7] %v621_v55  ;;  %v155_v36 = vadd.f32 %v131_v12, %v26_v20  ;;  %v476_v13 = vrot.slane %v1565_v3, %v1455_v59  ;;  %v611_v22 = vrot.slane %v1429_v49, %v1358_v21 }
  0x28   :  { %v1236_v15 = vld [vmem:[%s2357_s3 + $0x1] ss:$8 sm:$0x30]  ;;  %2413 = vst [vmem:[#allocation35_spill] sm:$0xff] %v1773_v10  ;;  %v385_v1 = vmul.f32 %v1192_v48, %v1776_v14  ;;  %v1784_v11 = vmul.f32 %v1204_v57, %v1776_v14  ;;  %v557_v20 = vor.u32 %v556_v37, %v555_v44  ;;  %v1792_v2 = vadd.f32 %v511_v16, %v408_v19  ;;  %v27_v48 = vld [vmem:[%s2356_s2 + $0x30] sm:$0xff] }
  0x29   :  { %v1216_v46 = vld [vmem:[%s2355_s1 + $0x268] sm:$0xff]  ;;  %v561_v35 = vor.u32 %v1236_v15, %v1235_v62  ;;  %v282_v59 = vadd.f32 %v258_v17, %v155_v36  ;;  %v1795_v49 = vrot.slane %v476_v13, %v1326_v7  ;;  %vm1797_vm6 = vcmp.eq.s32.totalorder %v611_v22, 1 }
  0x2a   :  { %2414 = vst [vmem:[#allocation36_spill] sm:$0xff] %v1784_v11  ;;  %v1228_v8 = vld [vmem:[%s2355_s1 + $0x2c8] sm:$0xff]  ;;  %v1803_v3 = vrot.slane %v557_v20, %v1320_v4  ;;  %v1807_v44 = vrot.slane %v557_v20, %v1322_v5  ;;  %v622_v37 = vsel %vm1709_vm5, %v1792_v2, -inf  ;;  %v1820_v55 = vrot.slane %v557_v20, %v1324_v6 }
  0x2b   :  { %v628_v57 = vrot.slane %v561_v35, %v1320_v4  ;;  %v632_v53 = vrot.slane %v561_v35, %v1322_v5  ;;  %v409_v16 = vadd.f32 %v385_v1, %v282_v59  ;;  %v512_v22 = vmul.f32 %v1216_v46, %v1795_v49  ;;  %1048 = vst [vmem:[#allocation2 + $0x20] sm:$0x7] %v622_v37  ;;  %v1237_v46 = vld [vmem:[%s2357_s3 + $0x2] ss:$8 sm:$0xf] }
  0x2c   :  { %v1814_v12 = vmul.f32 %v1228_v8, %v1795_v49  ;;  %v636_v15 = vrot.slane %v561_v35, %v1324_v6  ;;  %v640_v19 = vrot.slane %v561_v35, %v1326_v7  ;;  %v1827_v36 = vrot.slane %v557_v20, %v1326_v7  ;;  %v1238_v8 = vld [vmem:[%s2357_s3 + $0x2] ss:$8 sm:$0x30] }
  0x2d   :  { %v655_v13 = vadd.f32 %v628_v57, %v1498_v25  ;;  %v656_v62 = vadd.f32 %v632_v53, %v1552_v61  ;;  %v536_v17 = vadd.f32 %v512_v22, %v409_v16  ;;  %v644_v1 = vrot.slane %v561_v35, %v1331_v9  ;;  %v1169_v16 = vld [vmem:[%s2355_s1 + $0xf0] sm:$0xff] }
  0x2e   :  { %2417 = vst [vmem:[#allocation37_spill] sm:$0xff] %v1814_v12  ;;  %v657_v53 = vadd.f32 %v636_v15, %v1627_v54  ;;  %v1840_v37 = vrot.slane %v557_v20, %v1331_v9  ;;  %v658_v12 = vadd.f32 %v640_v19, %v1742_v47  ;;  %v1852_v15 = vrot.slane %v557_v20, %v1358_v21 }
  0x2f   :  { %v692_v59 = vmul.f32 %v1803_v3, %v655_v13  ;;  %v693_v57 = vmul.f32 %v1807_v44, %v656_v62  ;;  %v623_v22 = vsel %vm1797_vm6, %v536_v17, -inf  ;;  %v659_v11 = vadd.f32 %v644_v1, %v1792_v2 }
  0x30   :  { %v648_v13 = vrot.slane %v561_v35, %v1358_v21  ;;  %1049 = vst [vmem:[#allocation2 + $0x28] sm:$0x7] %v623_v22  ;;  %v694_v62 = vmul.f32 %v1820_v55, %v657_v53  ;;  %v565_v10 = vor.u32 %v1238_v8, %v1237_v46  ;;  %v132_v42 = vmul.f32 %v1363_v23, %v51_v32 }
  0x31   :  { %1050 = vst [vmem:[#allocation2] sm:$0x38] %v692_v59  ;;  %1051 = vst [vmem:[#allocation2 + $0x8] sm:$0x38] %v693_v57  ;;  %v695_v19 = vmul.f32 %v1827_v36, %v658_v12  ;;  %v696_v1 = vmul.f32 %v1840_v37, %v659_v11  ;;  %v259_v59 = vmul.f32 %v1169_v16, %v1366_v24 }
  0x32   :  { %v660_v35 = vadd.f32 %v648_v13, %v536_v17 }
  0x33   :  { %9 = vsyncpa [#allocation3], 0  ;;  %1052 = vst [vmem:[#allocation2 + $0x10] sm:$0x38] %v694_v62  ;;  %v1862_v57 = vrot.slane %v565_v10, %v1320_v4  ;;  %v1865_v20 = vrot.slane %v565_v10, %v1322_v5  ;;  %v1868_v46 = vrot.slane %v565_v10, %v1324_v6  ;;  %v1871_v32 = vrot.slane %v565_v10, %v1326_v7  ;;  %v1193_v11 = vld [vmem:[%s2355_s1 + $0x1b0] sm:$0xff]  ;;  %v54_v6 = vld [vmem:[%s2355_s1 + $0x48] sm:$0xff] }
  0x34   :  { %1053 = vst [vmem:[#allocation2 + $0x18] sm:$0x38] %v695_v19  ;;  %1054 = vst [vmem:[#allocation2 + $0x20] sm:$0x38] %v696_v1  ;;  %v697_v12 = vmul.f32 %v1852_v15, %v660_v35  ;;  %v1878_v8 = vrot.slane %v565_v10, %v1331_v9  ;;  %v1881_v53 = vrot.slane %v565_v10, %v1358_v21  ;;  %v1217_v1 = vld [vmem:[%s2355_s1 + $0x270] sm:$0xff]  ;;  %v1194_v35 = vld [vmem:[%s2355_s1 + $0x1b8] sm:$0xff] }
  0x35   :  { %v156_v16 = vadd.f32 %v132_v42, %v27_v48  ;;  %v729_v22 = vadd.f32 %v1862_v57, %v1498_v25  ;;  %v730_v13 = vadd.f32 %v1865_v20, %v1552_v61  ;;  %v731_v62 = vadd.f32 %v1868_v46, %v1627_v54  ;;  %v52_v42 = vld [vmem:[%s2355_s1 + $0x38] sm:$0xff]  ;;  %v1171_v21 = vld [vmem:[%s2355_s1 + $0x100] sm:$0xff]  ;;  %v1172_v5 = vld [vmem:[%s2355_s1 + $0x108] sm:$0xff] }
  0x36   :  { %v732_v19 = vadd.f32 %v1871_v32, %v1742_v47  ;;  %1055 = vst [vmem:[#allocation2 + $0x28] sm:$0x38] %v697_v12  ;;  %v733_v25 = vadd.f32 %v1878_v8, %v1792_v2  ;;  %v734_v61 = vadd.f32 %v1881_v53, %v536_v17  ;;  %v386_v54 = vmul.f32 %v1193_v11, %v1372_v26  ;;  %v28_v47 = vld [vmem:[%s2356_s2 + $0x38] sm:$0xff]  ;;  %v1195_v9 = vld [vmem:[%s2355_s1 + $0x1c0] sm:$0xff]  ;;  %v1196_v4 = vld [vmem:[%s2355_s1 + $0x1c8] sm:$0xff] }
  0x37   :  { %v283_v10 = vadd.f32 %v259_v59, %v156_v16  ;;  %v1170_v48 = vld [vmem:[%s2355_s1 + $0xf8] sm:$0xff]  ;;  %v741_v17 = vmul.f32 %v729_v22, %v1803_v3  ;;  %v742_v59 = vmul.f32 %v730_v13, %v1807_v44  ;;  %v743_v11 = vmul.f32 %v731_v62, %v1820_v55  ;;  %v53_v16 = vld [vmem:[%s2355_s1 + $0x40] sm:$0xff] }
  0x38   :  { %v1218_v2 = vld [vmem:[%s2355_s1 + $0x278] sm:$0xff]  ;;  %v744_v12 = vmul.f32 %v732_v19, %v1827_v36  ;;  %v745_v22 = vmul.f32 %v733_v25, %v1840_v37  ;;  %v746_v13 = vmul.f32 %v734_v61, %v1852_v15  ;;  %v513_v62 = vmul.f32 %v1217_v1, %v1381_v29  ;;  %v1219_v19 = vld [vmem:[%s2355_s1 + $0x280] sm:$0xff] }
  0x39   :  { %v410_v7 = vadd.f32 %v386_v54, %v283_v10  ;;  %1056 = vst [vmem:[#allocation2] sm:$0xc0] %v741_v17  ;;  %1057 = vst [vmem:[#allocation2 + $0x8] sm:$0xc0] %v742_v59  ;;  %v133_v25 = vmul.f32 %v1397_v34, %v52_v42  ;;  %v260_v1 = vmul.f32 %v1170_v48, %v1447_v56  ;;  %v29_v54 = vld [vmem:[%s2356_s2 + $0x40] sm:$0xff]  ;;  %v1220_v17 = vld [vmem:[%s2355_s1 + $0x288] sm:$0xff] }
  0x3a   :  { %1058 = vst [vmem:[#allocation2 + $0x10] sm:$0xc0] %v743_v11  ;;  %1059 = vst [vmem:[#allocation2 + $0x18] sm:$0xc0] %v744_v12  ;;  %v387_v61 = vmul.f32 %v1194_v35, %v1453_v58  ;;  %v514_v10 = vmul.f32 %v1218_v2, %v1501_v27  ;;  %v134_v48 = vmul.f32 %v1492_v18, %v53_v16  ;;  %v30_v59 = vld [vmem:[%s2356_s2 + $0x48] sm:$0xff]  ;;  %v55_v11 = vld [vmem:[%s2355_s1 + $0x50] sm:$0xff] }
  0x3b   :  { %1060 = vst [vmem:[#allocation2 + $0x20] sm:$0xc0] %v745_v22  ;;  %1061 = vst [vmem:[#allocation2 + $0x28] sm:$0xc0] %v746_v13  ;;  %v1951_v42 = vadd.f32 %v513_v62, %v410_v7  ;;  %v261_v35 = vmul.f32 %v1171_v21, %v1521_v39  ;;  %v388_v2 = vmul.f32 %v1195_v9, %v1537_v50  ;;  %v1173_v12 = vld [vmem:[%s2355_s1 + $0x110] sm:$0xff]  ;;  %vm825_vm7 = vcmask 1042432  }
  0x3c   :  { %v157_v7 = vadd.f32 %v133_v25, %v28_v47  ;;  %v515_v22 = vmul.f32 %v1219_v19, %v1550_v60  ;;  %v135_v16 = vmul.f32 %v1592_v30, %v54_v6  ;;  %v262_v21 = vmul.f32 %v1172_v5, %v1611_v41  ;;  %v1197_v9 = vld [vmem:[%s2355_s1 + $0x1d0] sm:$0xff]  ;;  %v56_v6 = vld [vmem:[%s2355_s1 + $0x58] sm:$0xff] }
  0x3d   :  { %v1221_v13 = vld [vmem:[%s2355_s1 + $0x290] sm:$0xff]  ;;  %v735_v62 = vadd.f32 %v1862_v57, %v1951_v42  ;;  %v158_v50 = vadd.f32 %v134_v48, %v29_v54  ;;  %v389_v47 = vmul.f32 %v1196_v4, %v1614_v43  ;;  %v516_v19 = vmul.f32 %v1220_v17, %v1623_v52  ;;  %v1174_v4 = vld [vmem:[%s2355_s1 + $0x118] sm:$0xff] }
  0x3e   :  { %v31_v5 = vld [vmem:[%s2356_s2 + $0x50] sm:$0xff]  ;;  %v284_v25 = vadd.f32 %v260_v1, %v157_v7  ;;  %v159_v41 = vadd.f32 %v135_v16, %v30_v59  ;;  %v136_v30 = vmul.f32 %v1665_v0, %v55_v11  ;;  %v263_v60 = vmul.f32 %v1173_v12, %v1668_v33  ;;  %v1198_v57 = vld [vmem:[%s2355_s1 + $0x1d8] sm:$0xff]  ;;  %v2005_v0 = vld [vmem:[%s2357_s3] sm:$0xe0] }
  0x3f   :  { %v1222_v54 = vld [vmem:[%s2355_s1 + $0x298] sm:$0xff]  ;;  %v747_v17 = vmul.f32 %v735_v62, %v1803_v3  ;;  %v285_v1 = vadd.f32 %v261_v35, %v158_v50  ;;  %v390_v48 = vmul.f32 %v1197_v9, %v1704_v28  ;;  %v517_v59 = vmul.f32 %v1221_v13, %v1707_v31  ;;  %v2010_v50 = vld [vmem:[%s2357_s3 + $0x8] sm:$0xe0] }
  0x40   :  { %v32_v11 = vld [vmem:[%s2356_s2 + $0x58] sm:$0xff]  ;;  %v411_v12 = vadd.f32 %v387_v61, %v284_v25  ;;  %v286_v7 = vadd.f32 %v262_v21, %v159_v41  ;;  %v160_v16 = vadd.f32 %v136_v30, %v31_v5  ;;  %v137_v33 = vmul.f32 %v1726_v45, %v56_v6 }
  0x41   :  { %1062 = vst [vmem:[#allocation2 + $0x30] sm:$0x1] %v747_v17  ;;  %v412_v3 = vadd.f32 %v388_v2, %v285_v1  ;;  %v264_v35 = vmul.f32 %v1174_v4, %v1732_v63  ;;  %v391_v61 = vmul.f32 %v1198_v57, %v1776_v14  ;;  %v518_v30 = vmul.f32 %v1222_v54, %v1795_v49 }
  0x42   :  { %v2015_v41 = vadd.f32 %v514_v10, %v411_v12  ;;  %v413_v21 = vadd.f32 %v389_v47, %v286_v7  ;;  %v287_v9 = vadd.f32 %v263_v60, %v160_v16  ;;  %v161_v13 = vadd.f32 %v137_v33, %v32_v11  ;;  %v2029_v60 = vld [vmem:[%s2357_s3 + $0x10] sm:$0xe0]  ;;  %v2034_v33 = vld [vmem:[%s2357_s3 + $0x18] sm:$0xe0]  ;;  %v2039_v10 = vld [vmem:[%s2357_s3 + $0x20] sm:$0xe0] }
  0x43   :  { %v2017_v62 = vadd.f32 %v515_v22, %v412_v3  ;;  %v753_v5 = vmul.f32 1.442695, %v1951_v42  ;;  %v771_v6 = vrot.slane %v2005_v0, 4  ;;  %v772_v25 = vrot.slane %v2010_v50, 4  ;;  %v2063_v12 = vld [vmem:[%s2357_s3 + $0x38] sm:$0x7] }
  0x44   :  { %v736_v2 = vadd.f32 %v1865_v20, %v2015_v41  ;;  %v2024_v4 = vadd.f32 %v516_v19, %v413_v21  ;;  %v414_v57 = vadd.f32 %v390_v48, %v287_v9  ;;  %v288_v54 = vadd.f32 %v264_v35, %v161_v13  ;;  %v2048_v19 = vld [vmem:[%s2357_s3 + $0x28] sm:$0xe0]  ;;  %v2076_v16 = vld [vmem:[%s2357_s3 + $0x48] sm:$0x7]  ;;  %v2081_v3 = vld [vmem:[%s2357_s3 + $0x50] sm:$0x7] }
  0x45   :  { %v737_v20 = vadd.f32 %v1868_v46, %v2017_v62  ;;  %1248 = vpow2.f32 %v753_v5  ;;  %v755_v22 = vmul.f32 1.442695, %v2015_v41  ;;  %v757_v47 = vmul.f32 1.442695, %v2017_v62  ;;  %v2058_v46 = vld [vmem:[%s2357_s3 + $0x30] sm:$0x7] }
  0x46   :  { %v748_v17 = vmul.f32 %v736_v2, %v1807_v44  ;;  %v738_v1 = vadd.f32 %v1871_v32, %v2024_v4  ;;  %v2053_v48 = vadd.f32 %v517_v59, %v414_v57  ;;  %v415_v11 = vadd.f32 %v391_v61, %v288_v54  ;;  %v2068_v44 = vld [vmem:[%s2357_s3 + $0x40] sm:$0x7]  ;;  %v2091_v21 = vld [vmem:[%s2357_s3 + $0x58] sm:$0x7]  ;;  %v63_v9 = vld [vmem:[%s2355_s1 + $0x90] sm:$0x7] }
  0x47   :  { %v749_v32 = vmul.f32 %v737_v20, %v1820_v55  ;;  %1250 = vpow2.f32 %v755_v22  ;;  %v773_v59 = vrot.slane %v2029_v60, 4  ;;  %v759_v7 = vmul.f32 1.442695, %v2024_v4  ;;  %v1181_v13 = vld [vmem:[%s2355_s1 + $0x150] sm:$0x7]  ;;  %v33_v22 = vld [vmem:[%s2356_s2 + $0x60] sm:$0xff] }
  0x48   :  { %1063 = vst [vmem:[#allocation2 + $0x38] sm:$0x1] %v748_v17  ;;  %v750_v35 = vmul.f32 %v738_v1, %v1827_v36  ;;  %v739_v55 = vadd.f32 %v1878_v8, %v2053_v48  ;;  %v2086_v61 = vadd.f32 %v518_v30, %v415_v11  ;;  %1252 = vpow2.f32 %v757_v47  ;;  %v1205_v5 = vld [vmem:[%s2355_s1 + $0x210] sm:$0x7]  ;;  %v34_v11 = vld [vmem:[%s2356_s2 + $0x68] sm:$0xff] }
  0x49   :  { %1064 = vst [vmem:[#allocation2 + $0x40] sm:$0x1] %v749_v32  ;;  %1254 = vpow2.f32 %v759_v7  ;;  %v774_v36 = vrot.slane %v2034_v33, 4  ;;  %v761_v8 = vmul.f32 1.442695, %v2053_v48  ;;  %v797_v1 = vrot.slane %v2068_v44, 4 }
  0x4a   :  { %1065 = vst [vmem:[#allocation2 + $0x48] sm:$0x1] %v750_v35  ;;  %v751_v2 = vmul.f32 %v739_v55, %v1840_v37  ;;  %v740_v57 = vadd.f32 %v1881_v53, %v2086_v61  ;;  %v763_v54 = vmul.f32 1.442695, %v2086_v61  ;;  %v39_v47 = vld [vmem:[%s2356_s2 + $0x90] sm:$0x7] }
  0x4b   :  { %v1229_v17 = vld [vmem:[%s2355_s1 + $0x2d0] sm:$0x7]  ;;  %1256 = vpow2.f32 %v761_v8  ;;  %v795_v37 = vrot.slane %v2058_v46, 4  ;;  %v796_v53 = vrot.slane %v2063_v12, 4  ;;  %v64_v32 = vld [vmem:[%s2355_s1 + $0x98] sm:$0x7]  ;;  %v398_v46 = vmul.f32 %v1205_v5, %v1372_v26 }
  0x4c   :  { %1066 = vst [vmem:[#allocation2 + $0x50] sm:$0x1] %v751_v2  ;;  %v752_v7 = vmul.f32 %v740_v57, %v1852_v15  ;;  %1258 = vpow2.f32 %v763_v54  ;;  %v798_v35 = vrot.slane %v2076_v16, 4  ;;  %v40_v12 = vld [vmem:[%s2356_s2 + $0x98] sm:$0x7]  ;;  %v144_v2 = vmul.f32 %v1363_v23, %v63_v9  ;;  %v35_v26 = vld [vmem:[%s2356_s2 + $0x70] sm:$0xff] }
  0x4d   :  { %v1182_v55 = vld [vmem:[%s2355_s1 + $0x158] sm:$0x7]  ;;  %v162_v15 = vadd.f32 %v1405_v38, %v33_v22  ;;  %v271_v57 = vmul.f32 %v1181_v13, %v1366_v24  ;;  %v525_v30 = vmul.f32 %v1229_v17, %v1381_v29  ;;  %v826_v8 = vrot.slane %v1951_v42, 5  ;;  %v65_v24 = vld [vmem:[%s2355_s1 + $0xa0] sm:$0x7] }
  0x4e   :  { %v1206_v54 = vld [vmem:[%s2355_s1 + $0x218] sm:$0x7]  ;;  %1067 = vst [vmem:[#allocation2 + $0x58] sm:$0x1] %v752_v7  ;;  %v145_v23 = vmul.f32 %v1397_v34, %v64_v32  ;;  %v168_v38 = vadd.f32 %v144_v2, %v39_v47  ;;  %v163_v13 = vadd.f32 %v1433_v51, %v34_v11  ;;  %v272_v22 = vmul.f32 %v1182_v55, %v1447_v56  ;;  %v1183_v29 = vld [vmem:[%s2355_s1 + $0x160] sm:$0x7] }
  0x4f   :  { %v1230_v20 = vld [vmem:[%s2355_s1 + $0x2d8] sm:$0x7]  ;;  %v289_v9 = vadd.f32 %v1409_v40, %v162_v15  ;;  %v1207_v34 = vld [vmem:[%s2355_s1 + $0x220] sm:$0x7]  ;;  %v399_v47 = vmul.f32 %v1206_v54, %v1453_v58  ;;  %v829_v51 = vrot.slane %v2015_v41, 5  ;;  %vm898_vm8 = vcmask 1045504  }
  0x50   :  { %v169_v5 = vadd.f32 %v145_v23, %v40_v12  ;;  %v526_v40 = vmul.f32 %v1230_v20, %v1501_v27  ;;  %v295_v56 = vadd.f32 %v271_v57, %v168_v38  ;;  %v2418_v17 = vld [vmem:[#allocation11_spill] sm:$0xff]  ;;  %v2419_v32 = vld [vmem:[#allocation13_spill] sm:$0xff]  ;;  %v146_v2 = vmul.f32 %v1492_v18, %v65_v24  ;;  %v2423_v18 = vld [vmem:[#allocation14_spill] sm:$0xff] }
  0x51   :  { %v416_v11 = vadd.f32 %v2418_v17, %v289_v9  ;;  %v290_v7 = vadd.f32 %v2419_v32, %v163_v13  ;;  %v41_v55 = vld [vmem:[%s2356_s2 + $0xa0] sm:$0x7]  ;;  %v2177_v27 = vmul.f32 %v1183_v29, %v1521_v39  ;;  %v2421_v20 = vld [vmem:[#allocation17_spill] sm:$0xff]  ;;  %v2422_v13 = vld [vmem:[#allocation12_spill] sm:$0xff]  ;;  %vm989_vm9 = vcmask 1040384  }
  0x52   :  { %v1249_v15 = vpop.eup %1248  ;;  %v296_v12 = vadd.f32 %v272_v22, %v169_v5  ;;  %v2420_v23 = vld [vmem:[#allocation15_spill] sm:$0xff]  ;;  %v2180_v57 = vmul.f32 %v1207_v34, %v2421_v20  ;;  %v422_v9 = vadd.f32 %v398_v46, %v295_v56  ;;  %v170_v5 = vadd.f32 %v146_v2, %v41_v55 }
  0x53   :  { %v164_v58 = vadd.f32 %v2420_v23, %v35_v26  ;;  %v783_v54 = vmul.f32 %v1249_v15, %v771_v6  ;;  %v807_v38 = vmul.f32 %v1249_v15, %v795_v37  ;;  %v543_v17 = vadd.f32 %v2422_v13, %v416_v11  ;;  %v2424_v26 = vld [vmem:[#allocation18_spill] sm:$0xff] }
  0x54   :  { %v1251_v32 = vpop.eup %1250  ;;  %v417_v24 = vadd.f32 %v2423_v18, %v290_v7  ;;  %v423_v22 = vadd.f32 %v399_v47, %v296_v12  ;;  %v549_v6 = vadd.f32 %v525_v30, %v422_v9  ;;  %v2425_v30 = vld [vmem:[#allocation16_spill] sm:$0xff]  ;;  %v1283_v55 = vmov 0.0  }
  0x55   :  { %v291_v23 = vadd.f32 %v2424_v26, %v164_v58  ;;  %v1253_v39 = vpop.eup %1252  ;;  %1068 = vst [vmem:[#allocation2 + $0x30] sm:$0xe] %v783_v54  ;;  %v784_v29 = vmul.f32 %v1251_v32, %v772_v25  ;;  %1074 = vst [vmem:[#allocation2 + $0x30] sm:$0x70] %v807_v38  ;;  %v808_v0 = vmul.f32 %v1251_v32, %v796_v53  ;;  %v827_v37 = vrot.slane %v543_v17, 5 }
  0x56   :  { %v1255_v46 = vpop.eup %1254  ;;  %v785_v34 = vmul.f32 %v1253_v39, %v773_v59  ;;  %v809_v56 = vmul.f32 %v1253_v39, %v797_v1  ;;  %v862_v47 = vrot.slane %v543_v17, 3  ;;  %v953_v11 = vrot.slane %v543_v17, 6 }
  0x57   :  { %1069 = vst [vmem:[#allocation2 + $0x38] sm:$0xe] %v784_v29  ;;  %v786_v7 = vmul.f32 %v1255_v46, %v774_v36  ;;  %1075 = vst [vmem:[#allocation2 + $0x38] sm:$0x70] %v808_v0  ;;  %v810_v50 = vmul.f32 %v1255_v46, %v798_v35  ;;  %v828_v25 = vsel %vm825_vm7, %v826_v8, %v827_v37  ;;  %v2426_v36 = vrot.slane %v2039_v10, 4 }
  0x58   :  { %v2199_v53 = vadd.f32 %v2425_v30, %v417_v24  ;;  %v1257_v60 = vpop.eup %1256  ;;  %1070 = vst [vmem:[#allocation2 + $0x40] sm:$0xe] %v785_v34  ;;  %1076 = vst [vmem:[#allocation2 + $0x40] sm:$0x70] %v809_v56  ;;  %vm850_vm10 = vcmp.gt.f32.partialorder %v543_v17, %v828_v25  ;;  %v874_v44 = vmax.f32 %v1951_v42, %v862_v47  ;;  %v2427_v35 = vrot.slane %v2081_v3, 4  ;;  %v2431_v25 = vld [vmem:[#allocation19_spill] sm:$0xff] }
  0x59   :  { %v880_v59 = vmax.f32 %v543_v17, %v862_v47  ;;  %v2202_v1 = vadd.f32 %v526_v40, %v423_v22  ;;  %v1259_v33 = vpop.eup %1258  ;;  %1071 = vst [vmem:[#allocation2 + $0x48] sm:$0xe] %v786_v7  ;;  %v787_v16 = vmul.f32 %v1257_v60, %v2426_v36  ;;  %1077 = vst [vmem:[#allocation2 + $0x48] sm:$0x70] %v810_v50  ;;  %v856_v2 = vsel %vm850_vm10, 1.0, %v1283_v55 }
  0x5a   :  { %v811_v8 = vmul.f32 %v1257_v60, %v2427_v35  ;;  %v830_v15 = vrot.slane %v2199_v53, 5  ;;  %v2428_v12 = vrot.slane %v2048_v19, 4  ;;  %v2429_v40 = vrot.slane %v2091_v21, 4  ;;  %v1231_v29 = vld [vmem:[%s2355_s1 + $0x2e0] sm:$0x7] }
  0x5b   :  { %v899_v20 = vrot.slane %v874_v44, 2  ;;  %v900_v54 = vrot.slane %v880_v59, 2  ;;  %1072 = vst [vmem:[#allocation2 + $0x50] sm:$0xe] %v787_v16  ;;  %v935_v10 = vrot.slane %v856_v2, 5  ;;  %v965_v38 = vmax.f32 %v874_v44, %v953_v11 }
  0x5c   :  { %v788_v42 = vmul.f32 %v1259_v33, %v2428_v12  ;;  %v812_v58 = vmul.f32 %v1259_v33, %v2429_v40  ;;  %1078 = vst [vmem:[#allocation2 + $0x50] sm:$0x70] %v811_v8  ;;  %v971_v9 = vmax.f32 %v880_v59, %v953_v11  ;;  %v831_v3 = vsel %vm825_vm7, %v829_v51, %v830_v15  ;;  %v2432_v33 = vld [vmem:[#allocation21_spill] sm:$0xff]  ;;  %v42_v16 = vld [vmem:[%s2356_s2 + $0xa8] sm:$0x7]  ;;  %v2433_v40 = vld [vmem:[#allocation22_spill] sm:$0xff] }
  0x5d   :  { %v901_v13 = vsel %vm898_vm8, %v899_v20, %v900_v54  ;;  %vm851_vm11 = vcmp.gt.f32.partialorder %v2199_v53, %v831_v3  ;;  %v863_v19 = vrot.slane %v2199_v53, 3  ;;  %v954_v21 = vrot.slane %v2199_v53, 6  ;;  %v1184_v12 = vld [vmem:[%s2355_s1 + $0x168] sm:$0x7] }
  0x5e   :  { %1073 = vst [vmem:[#allocation2 + $0x58] sm:$0xe] %v788_v42  ;;  %1079 = vst [vmem:[#allocation2 + $0x58] sm:$0x70] %v812_v58  ;;  %vm923_vm12 = vcmp.gt.f32.partialorder %v543_v17, %v901_v13  ;;  %v990_v32 = vrot.slane %v965_v38, 7  ;;  %v991_v18 = vrot.slane %v971_v9, 7  ;;  %v297_v46 = vadd.f32 %v2177_v27, %v170_v5 }
  0x5f   :  { %v857_v24 = vsel %vm851_vm11, 1.0, %v1283_v55  ;;  %v947_v22 = vsel %vm923_vm12, 2.0, %v935_v10  ;;  %v875_v26 = vmax.f32 %v2015_v41, %v863_v19  ;;  %v881_v51 = vmax.f32 %v2199_v53, %v863_v19  ;;  %v2430_v17 = vld [vmem:[#allocation20_spill] sm:$0xff]  ;;  %v36_v27 = vld [vmem:[%s2356_s2 + $0x78] sm:$0xff]  ;;  %v2435_v19 = vld [vmem:[#allocation23_spill] sm:$0xff] }
  0x60   :  { %v936_v39 = vrot.slane %v857_v24, 5  ;;  %v992_v0 = vsel %vm989_vm9, %v990_v32, %v991_v18  ;;  %v1026_v37 = vrot.slane %v947_v22, 5  ;;  %v418_v34 = vadd.f32 %v2430_v17, %v291_v23  ;;  %v66_v5 = vld [vmem:[%s2355_s1 + $0xa8] sm:$0x7] }
  0x61   :  { %vm1014_vm13 = vcmp.gt.f32.partialorder %v549_v6, %v992_v0  ;;  %v902_v56 = vrot.slane %v875_v26, 2  ;;  %v903_v47 = vrot.slane %v881_v51, 2  ;;  %v966_v11 = vmax.f32 %v875_v26, %v954_v21  ;;  %v2434_v20 = vld [vmem:[#allocation24_spill] sm:$0xff] }
  0x62   :  { %v1038_v7 = vsel %vm1014_vm13, 3.0, %v1026_v37  ;;  %v972_v41 = vmax.f32 %v881_v51, %v954_v21  ;;  %v424_v50 = vadd.f32 %v2180_v57, %v297_v46  ;;  %v527_v30 = vmul.f32 %v1231_v29, %v2431_v25  ;;  %v1208_v32 = vld [vmem:[%s2355_s1 + $0x228] sm:$0x7]  ;;  %v2436_v29 = vld [vmem:[#allocation25_spill] sm:$0xff] }
  0x63   :  { %v1086_v60 = vrot.slane %v1038_v7, 1  ;;  %v904_v44 = vsel %vm898_vm8, %v902_v56, %v903_v47  ;;  %v993_v59 = vrot.slane %v966_v11, 7  ;;  %v545_v36 = vadd.f32 %v2432_v33, %v418_v34  ;;  %v1232_v18 = vld [vmem:[%s2355_s1 + $0x2e8] sm:$0x7]  ;;  %v67_v37 = vld [vmem:[%s2355_s1 + $0xb0] sm:$0x7] }
  0x64   :  { %vm924_vm14 = vcmp.gt.f32.partialorder %v2199_v53, %v904_v44  ;;  %v994_v23 = vrot.slane %v972_v41, 7  ;;  %v551_v57 = vadd.f32 %v527_v30, %v424_v50  ;;  %v832_v6 = vrot.slane %v2017_v62, 5  ;;  %v37_v47 = vld [vmem:[%s2356_s2 + $0x80] sm:$0xff]  ;;  %v2437_v41 = vld [vmem:[#allocation26_spill] sm:$0xff]  ;;  %v43_v25 = vld [vmem:[%s2356_s2 + $0xb0] sm:$0x7] }
  0x65   :  { %1098 = vst [vmem:[#allocation2 + $0x60] ss:$-44 sps:$4 sm:$0x83] %v1086_v60   ;;  %v948_v35 = vsel %vm924_vm14, 2.0, %v936_v39  ;;  %v833_v8 = vrot.slane %v545_v36, 5  ;;  %v864_v2 = vrot.slane %v545_v36, 3  ;;  %v147_v58 = vmul.f32 %v2433_v40, %v66_v5 }
  0x66   :  { %v955_v15 = vrot.slane %v545_v36, 6  ;;  %v995_v42 = vsel %vm989_vm9, %v993_v59, %v994_v23  ;;  %v1027_v53 = vrot.slane %v948_v35, 5  ;;  %v165_v54 = vadd.f32 %v2434_v20, %v36_v27  ;;  %v1185_v30 = vld [vmem:[%s2355_s1 + $0x170] sm:$0x7]  ;;  %v2438_v44 = vld [vmem:[#allocation28_spill] sm:$0xff]  ;;  %v2439_v27 = vld [vmem:[#allocation27_spill] sm:$0xff] }
  0x67   :  { %vm1015_vm15 = vcmp.gt.f32.partialorder %v2202_v1, %v995_v42  ;;  %v834_v10 = vsel %vm825_vm7, %v832_v6, %v833_v8  ;;  %v876_v38 = vmax.f32 %v2017_v62, %v864_v2  ;;  %v882_v9 = vmax.f32 %v545_v36, %v864_v2  ;;  %v2440_v23 = vld [vmem:[#allocation30_spill] sm:$0xff]  ;;  %v2441_v2 = vld [vmem:[#allocation29_spill] sm:$0xff] }
  0x68   :  { %v1039_v3 = vsel %vm1015_vm15, 3.0, %v1027_v53  ;;  %vm852_vm0 = vcmp.gt.f32.partialorder %v545_v36, %v834_v10  ;;  %v171_v13 = vadd.f32 %v147_v58, %v42_v16  ;;  %v274_v21 = vmul.f32 %v1184_v12, %v2435_v19  ;;  %v1209_v16 = vld [vmem:[%s2355_s1 + $0x230] sm:$0x7] }
  0x69   :  { %v1087_v24 = vrot.slane %v1039_v3, 1  ;;  %v858_v1 = vsel %vm852_vm0, 1.0, %v1283_v55  ;;  %v905_v22 = vrot.slane %v876_v38, 2  ;;  %v906_v26 = vrot.slane %v882_v9, 2  ;;  %v1233_v12 = vld [vmem:[%s2355_s1 + $0x2f0] sm:$0x7] }
  0x6a   :  { %v937_v62 = vrot.slane %v858_v1, 5  ;;  %v967_v51 = vmax.f32 %v876_v38, %v955_v15  ;;  %v973_v39 = vmax.f32 %v882_v9, %v955_v15  ;;  %v292_v0 = vadd.f32 %v2436_v29, %v165_v54  ;;  %v2442_v54 = vld [vmem:[#allocation31_spill] sm:$0xff]  ;;  %v38_v1 = vld [vmem:[%s2356_s2 + $0x88] sm:$0xff] }
  0x6b   :  { %1099 = vst [vmem:[#allocation2 + $0x68] ss:$-44 sps:$4 sm:$0x83] %v1087_v24   ;;  %v907_v46 = vsel %vm898_vm8, %v905_v22, %v906_v26  ;;  %v298_v17 = vadd.f32 %v274_v21, %v171_v13  ;;  %v401_v34 = vmul.f32 %v1208_v32, %v1614_v43  ;;  %v528_v56 = vmul.f32 %v1232_v18, %v1623_v52  ;;  %v2443_v21 = vld [vmem:[#allocation32_spill] sm:$0xff] }
  0x6c   :  { %vm925_vm1 = vcmp.gt.f32.partialorder %v545_v36, %v907_v46  ;;  %v996_v11 = vrot.slane %v967_v51, 7  ;;  %v997_v7 = vrot.slane %v973_v39, 7  ;;  %v419_v50 = vadd.f32 %v2437_v41, %v292_v0  ;;  %v2444_v39 = vld [vmem:[#allocation33_spill] sm:$0xff]  ;;  %v1186_v46 = vld [vmem:[%s2355_s1 + $0x178] sm:$0x7] }
  0x6d   :  { %v949_v43 = vsel %vm925_vm1, 2.0, %v937_v62  ;;  %v425_v60 = vadd.f32 %v401_v34, %v298_v17  ;;  %v835_v52 = vrot.slane %v2024_v4, 5  ;;  %v148_v59 = vmul.f32 %v2438_v44, %v67_v37  ;;  %v44_v37 = vld [vmem:[%s2356_s2 + $0xb8] sm:$0x7] }
  0x6e   :  { %v998_v33 = vsel %vm989_vm9, %v996_v11, %v997_v7  ;;  %v1028_v36 = vrot.slane %v949_v43, 5  ;;  %v546_v5 = vadd.f32 %v2439_v27, %v419_v50  ;;  %v166_v6 = vadd.f32 %v2440_v23, %v37_v47  ;;  %v2445_v47 = vld [vmem:[#allocation34_spill] sm:$0xff] }
  0x6f   :  { %vm1016_vm2 = vcmp.gt.f32.partialorder %v551_v57, %v998_v33  ;;  %v552_v35 = vadd.f32 %v528_v56, %v425_v60  ;;  %v172_v8 = vadd.f32 %v148_v59, %v43_v25  ;;  %v275_v15 = vmul.f32 %v1185_v30, %v2441_v2 }
  0x70   :  { %v1040_v42 = vsel %vm1016_vm2, 3.0, %v1028_v36  ;;  %v836_v53 = vrot.slane %v546_v5, 5  ;;  %v865_v40 = vrot.slane %v546_v5, 3  ;;  %v956_v58 = vrot.slane %v546_v5, 6  ;;  %v2446_v36 = vld [vmem:[#allocation35_spill] sm:$0xff] }
  0x71   :  { %v1088_v20 = vrot.slane %v1040_v42, 1  ;;  %v293_v10 = vadd.f32 %v2442_v54, %v166_v6  ;;  %v299_v38 = vadd.f32 %v275_v15, %v172_v8  ;;  %v402_v9 = vmul.f32 %v1209_v16, %v1704_v28  ;;  %v68_v28 = vld [vmem:[%s2355_s1 + $0xb8] sm:$0x7]  ;;  %v1239_v8 = vld [vmem:[%s2357_s3 + $0x3] ss:$8 sm:$0xf] }
  0x72   :  { %v837_v57 = vsel %vm825_vm7, %v835_v52, %v836_v53  ;;  %v877_v3 = vmax.f32 %v2024_v4, %v865_v40  ;;  %v883_v13 = vmax.f32 %v546_v5, %v865_v40  ;;  %v529_v19 = vmul.f32 %v1233_v12, %v1707_v31  ;;  %v1240_v12 = vld [vmem:[%s2357_s3 + $0x3] ss:$8 sm:$0x30]  ;;  %v1234_v54 = vld [vmem:[%s2355_s1 + $0x2f8] sm:$0x7] }
  0x73   :  { %1100 = vst [vmem:[#allocation2 + $0x70] ss:$-44 sps:$4 sm:$0x83] %v1088_v20   ;;  %vm853_vm3 = vcmp.gt.f32.partialorder %v546_v5, %v837_v57  ;;  %v420_v32 = vadd.f32 %v2443_v21, %v293_v10  ;;  %v426_v18 = vadd.f32 %v402_v9, %v299_v38  ;;  %v838_v24 = vrot.slane %v2053_v48, 5  ;;  %v2448_v9 = vld [vmem:[#allocation37_spill] sm:$0xff] }
  0x74   :  { %v859_v4 = vsel %vm853_vm3, 1.0, %v1283_v55  ;;  %v908_v22 = vrot.slane %v877_v3, 2  ;;  %v909_v26 = vrot.slane %v883_v13, 2  ;;  %v968_v31 = vmax.f32 %v877_v3, %v956_v58 }
  0x75   :  { %v938_v62 = vrot.slane %v859_v4, 5  ;;  %v974_v51 = vmax.f32 %v883_v13, %v956_v58  ;;  %v547_v29 = vadd.f32 %v2444_v39, %v420_v32  ;;  %v553_v0 = vadd.f32 %v529_v19, %v426_v18  ;;  %v2447_v58 = vld [vmem:[#allocation36_spill] sm:$0xff]  ;;  %v2449_v4 = vld [vmem:[#allocation5_spill] sm:$0xff]  ;;  %v2451_v39 = vld [vmem:[#allocation7_spill] sm:$0xff] }
  0x76   :  { %v910_v17 = vsel %vm898_vm8, %v908_v22, %v909_v26  ;;  %v999_v34 = vrot.slane %v968_v31, 7  ;;  %v149_v56 = vmul.f32 %v1726_v45, %v68_v28  ;;  %v167_v11 = vadd.f32 %v2445_v47, %v38_v1  ;;  %v2450_v26 = vld [vmem:[#allocation6_spill] sm:$0xff] }
  0x77   :  { %vm926_vm4 = vcmp.gt.f32.partialorder %v546_v5, %v910_v17  ;;  %v1000_v7 = vrot.slane %v974_v51, 7  ;;  %v839_v41 = vrot.slane %v547_v29, 5  ;;  %v866_v50 = vrot.slane %v547_v29, 3  ;;  %v1210_v5 = vld [vmem:[%s2355_s1 + $0x238] sm:$0x7]  ;;  %s1284_s1 = smov [#allocation2]  }
  0x78   :  { %v950_v25 = vsel %vm926_vm4, 2.0, %v938_v62  ;;  %v957_v30 = vrot.slane %v547_v29, 6  ;;  %v173_v43 = vadd.f32 %v149_v56, %v44_v37  ;;  %v276_v60 = vmul.f32 %v1186_v46, %v1732_v63  ;;  %v2452_v37 = vld [vmem:[#allocation8_spill] sm:$0xff]  ;;  %v2453_v56 = vld [vmem:[#allocation9_spill] sm:$0xff]  ;;  %s1152_s3 = sshll.u32 %s1284_s1, 4  ;;  %s1153_s3 = int_to_ptr.vmem [resolvable:$true] %s1152_s3 }
  0x79   :  { %v1001_v52 = vsel %vm989_vm9, %v999_v34, %v1000_v7  ;;  %v1029_v44 = vrot.slane %v950_v25, 5  ;;  %v840_v59 = vsel %vm825_vm7, %v838_v24, %v839_v41  ;;  %v878_v33 = vmax.f32 %v2053_v48, %v866_v50  ;;  %s1260_s9 = scalar_lea.vmem %s1153_s3, 2304  ;;  %p1265_p1 = scmp.lt.s32.totalorder %s1153_s3, %s1153_s3 }
  0x7a   :  { %vm1017_vm5 = vcmp.gt.f32.partialorder %v552_v35, %v1001_v52  ;;  %vm854_vm6 = vcmp.gt.f32.partialorder %v547_v29, %v840_v59  ;;  %v884_v45 = vmax.f32 %v547_v29, %v866_v50  ;;  %v294_v27 = vadd.f32 %v2446_v36, %v167_v11  ;;  %v2454_v11 = vld [vmem:[#allocation10_spill] sm:$0xff]  ;;  %p1261_p0 = scmp.ne.s32.totalorder %s1153_s3, %s1260_s9  ;;  %p1266_p2 = scmp.lt.s32.totalorder %s1260_s9, %s1260_s9 }
  0x7b   :  { %v1041_v23 = vsel %vm1017_vm5, 3.0, %v1029_v44  ;;  %v860_v6 = vsel %vm854_vm6, 1.0, %v1283_v55  ;;  %v911_v63 = vrot.slane %v878_v33, 2  ;;  %v969_v16 = vmax.f32 %v878_v33, %v957_v30 }
  0x7c   :  { %v1089_v2 = vrot.slane %v1041_v23, 1  ;;  %v912_v48 = vrot.slane %v884_v45, 2  ;;  %v939_v35 = vrot.slane %v860_v6, 5  ;;  %v975_v15 = vmax.f32 %v884_v45, %v957_v30  ;;  %p1267_p3 = por %p1266_p2, %p1265_p1 }
  0x7d   :  { %v1002_v42 = vrot.slane %v969_v16, 7  ;;  %v300_v53 = vadd.f32 %v276_v60, %v173_v43  ;;  %v403_v40 = vmul.f32 %v1210_v5, %v1776_v14  ;;  %v421_v20 = vadd.f32 %v2447_v58, %v294_v27 }
  0x7e   :  { %1101 = vst [vmem:[#allocation2 + $0x78] ss:$-44 sps:$4 sm:$0x83] %v1089_v2   ;;  %v913_v10 = vsel %vm898_vm8, %v911_v63, %v912_v48  ;;  %v1003_v38 = vrot.slane %v975_v15, 7  ;;  %v841_v3 = vrot.slane %v2086_v61, 5  ;;  %v569_v13 = vor.u32 %v1240_v12, %v1239_v8  ;;  %p1268_p4 = pnand %p1267_p3, %p1261_p0 }
  0x7f   :  { %vm927_vm10 = vcmp.gt.f32.partialorder %v547_v29, %v913_v10  ;;  %v548_v57 = vadd.f32 %v2448_v9, %v421_v20  ;;  %v530_v14 = vmul.f32 %v1234_v54, %v1795_v49  ;;  %v427_v18 = vadd.f32 %v403_v40, %v300_v53 }
  0x80   :  { %v951_v19 = vsel %vm927_vm10, 2.0, %v939_v35  ;;  %v1004_v21 = vsel %vm989_vm9, %v1002_v42, %v1003_v38  ;;  %v1114_v22 = vrot.slane %v569_v13, %v2449_v4  ;;  %v1118_v31 = vrot.slane %v569_v13, %v2450_v26 }
  0x81   :  { %vm1018_vm11 = vcmp.gt.f32.partialorder %v553_v0, %v1004_v21  ;;  %v1030_v32 = vrot.slane %v951_v19, 5  ;;  %v842_v24 = vrot.slane %v548_v57, 5  ;;  %v867_v1 = vrot.slane %v548_v57, 3 }
  0x82   :  { %v958_v28 = vrot.slane %v548_v57, 6  ;;  %v1122_v29 = vrot.slane %v569_v13, %v2451_v39  ;;  %v1126_v46 = vrot.slane %v569_v13, %v2452_v37  ;;  %1141 = vst [vmem:[#allocation2 + $0x60] sm:$0x1c] %v1114_v22  ;;  %1142 = vst [vmem:[#allocation2 + $0x68] sm:$0x1c] %v1118_v31  ;;  %v1130_v47 = vrot.slane %v569_v13, %v2453_v56 }
  0x83   :  { %v1042_v62 = vsel %vm1018_vm11, 3.0, %v1030_v32  ;;  %v843_v51 = vsel %vm825_vm7, %v841_v3, %v842_v24  ;;  %v879_v49 = vmax.f32 %v2086_v61, %v867_v1  ;;  %v885_v0 = vmax.f32 %v548_v57, %v867_v1 }
  0x84   :  { %v1090_v17 = vrot.slane %v1042_v62, 1  ;;  %vm855_vm12 = vcmp.gt.f32.partialorder %v548_v57, %v843_v51  ;;  %1143 = vst [vmem:[#allocation2 + $0x70] sm:$0x1c] %v1122_v29  ;;  %1144 = vst [vmem:[#allocation2 + $0x78] sm:$0x1c] %v1126_v46  ;;  %v1134_v7 = vrot.slane %v569_v13, %v2454_v11  ;;  %v554_v61 = vadd.f32 %v530_v14, %v427_v18 }
  0x85   :  { %v861_v34 = vsel %vm855_vm12, 1.0, %v1283_v55  ;;  %v914_v41 = vrot.slane %v879_v49, 2  ;;  %v915_v50 = vrot.slane %v885_v0, 2  ;;  %v970_v30 = vmax.f32 %v879_v49, %v958_v28  ;;  %1145 = vst [vmem:[#allocation2 + $0x80] sm:$0x1c] %v1130_v47 }
  0x86   :  { %1102 = vst [vmem:[#allocation2 + $0x80] ss:$-44 sps:$4 sm:$0x83] %v1090_v17   ;;  %v940_v25 = vrot.slane %v861_v34, 5  ;;  %v976_v43 = vmax.f32 %v885_v0, %v958_v28  ;;  %1146 = vst [vmem:[#allocation2 + $0x88] sm:$0x1c] %v1134_v7 }
  0x87   :  { %v916_v60 = vsel %vm898_vm8, %v914_v41, %v915_v50  ;;  %v1005_v52 = vrot.slane %v970_v30, 7 }
  0x88   :  { %vm928_vm7 = vcmp.gt.f32.partialorder %v548_v57, %v916_v60  ;;  %v1006_v55 = vrot.slane %v976_v43, 7 }
  0x89   :  { %v952_v44 = vsel %vm928_vm7, 2.0, %v940_v25 }
  0x8a   :  { %v1007_v59 = vsel %vm989_vm9, %v1005_v52, %v1006_v55  ;;  %v1031_v33 = vrot.slane %v952_v44, 5 }
  0x8b   :  { %vm1019_vm13 = vcmp.gt.f32.partialorder %v554_v61, %v1007_v59 }
  0x8c   :  { %v1043_v45 = vsel %vm1019_vm13, 3.0, %v1031_v33 }
  0x8d   :  { %v1091_v36 = vrot.slane %v1043_v45, 1 }
  0x8f   :  { %1103 = vst [vmem:[#allocation2 + $0x88] ss:$-44 sps:$4 sm:$0x83] %v1091_v36  }
  0x90   :  { %1271 = shalt.err (!%p1268_p4)
}
  0x91   :  { %s1285_s10 = smov 768   ;;  %s1286_s11 = smov 48  }
  0x92   :  { %1158 = dma.vmem_to_hbm [thread:$0]  %s1153_s3, 2304, %s2358_s4, [#allocation3], %s1285_s10, %s1285_s10, %s1286_s11  }
  0x93   :  { %1280 = dma.done.wait [#allocation3], 2304  }
  0x94   :  { %1281 = vsyncadd [#allocation3], 4294964992 }
  0x95   :  { %1162 = vsyncpa [#allocation3], 1 }

</bundles_post_ra>
